<compile_context>
chip_gen: v6e
topology: v6e:2x2x1
jax: 0.10.0
libtpu: 0.0.40
codegen_flags: <defaults>
</compile_context>

<pallas_src>
import jax
import jax.numpy as jnp
from jax.experimental import pallas as pl
from jax.experimental.pallas import tpu as pltpu


# ----------------------------------------------------------------------------- kernel
def encoder_kernel(x_ref,      # (T*B, 2E)  row block t = [x_t | x_{T-1-t}]
                   wih_ref,    # (2E, 6H)   block-diag, gate order [r_f|r_b|z_f|z_b|n_f|n_b]
                   whh_ref,    # (2H, 6H)   block-diag, same gate order
                   bx_ref,     # (1, 6H)    input-side bias (b_ih + b_hh for r/z, b_ih for n)
                   bhn_ref,    # (1, 2H)    hidden-side n-gate bias [fwd | bwd]
                   fcw_ref,    # (2H, D)
                   fcb_ref,    # (1, D)
                   out_ref,    # (2T, B, H) rows [0:T] = fwd h_t, rows [T:2T] = bwd h_t
                   hid_ref):   # (B, D)
    T = out_ref.shape[0] // 2
    B = out_ref.shape[1]
    H2 = whh_ref.shape[0]          # 2H
    H = H2 // 2
    md = whh_ref.dtype             # matmul operand dtype (bf16 default, f32 optional)

    # ---- prologue: ONE fused input projection (both directions, all gates) ----
    # gx[t*B:(t+1)*B] = [r_f(t)|r_b(T-1-t)|z_f(t)|z_b(T-1-t)|n_f(t)|n_b(T-1-t)] + bias
    gx = jnp.dot(x_ref[...], wih_ref[...],
                 preferred_element_type=jnp.float32) + bx_ref[...]

    whh = whh_ref[...]             # recurrent weights loaded once (hoisted)
    bhn = bhn_ref[...]

    # Carry holds both directions lane-concatenated: h_cat = [h_f | h_b], f32.
    h_cat = jnp.zeros((B, H2), jnp.float32)

    # Fully unrolled (T is a small static int): the forward chain advances t = 0..T-1
    # while the backward chain, living in the same carry, advances reversed time.
    for t in range(T):
        gh = jnp.dot(h_cat.astype(md), whh, preferred_element_type=jnp.float32)
        gx_t = gx[t * B:(t + 1) * B, :]
        r = jax.nn.sigmoid(gx_t[:, :H2] + gh[:, :H2])
        z = jax.nn.sigmoid(gx_t[:, H2:2 * H2] + gh[:, H2:2 * H2])
        n = jnp.tanh(gx_t[:, 2 * H2:] + r * (gh[:, 2 * H2:] + bhn))
        h_cat = (1.0 - z) * n + z * h_cat
        # Per-step stores bound vreg live ranges (no stack/concat epilogue in-kernel).
        out_ref[t] = h_cat[:, :H]                  # forward hidden at time t
        out_ref[2 * T - 1 - t] = h_cat[:, H:]      # backward hidden at orig time T-1-t

    # hidden = tanh(cat(h_f_final, h_b_final) @ fc_w + fc_b); carry is already in cat order.
    hid_ref[...] = jnp.tanh(
        jnp.dot(h_cat.astype(md), fcw_ref[...],
                preferred_element_type=jnp.float32) + fcb_ref[...])


# ---------------------------------------------------------------------------- wrapper
def encoder_forward(src, params, matmul_dtype=jnp.bfloat16):
    f32 = jnp.float32
    md = matmul_dtype

    # Embedding lookup (gather) + dropout (identity in eval mode) stay in JAX glue.
    emb = jnp.take(params["embedding"], src, axis=0).astype(f32)     # (T, B, E)
    T, B, E = emb.shape
    H = params["w_hh_f"].shape[0]
    D = params["fc_w"].shape[1]

    # Pair x_t (fwd) with x_{T-1-t} (bwd) on the lane axis so a single block-diagonal
    # projection serves both directions, already in reversed time for the bwd chain.
    x_cat = jnp.concatenate([emb, emb[::-1]], axis=-1).reshape(T * B, 2 * E)

    # Fused, block-structured weights; lane order [r_f | r_b | z_f | z_b | n_f | n_b]
    # so in-kernel gate slices align with the lane-concatenated carry [h_f | h_b].
    def fuse_blockdiag(w_f, w_b, in_dim):
        w = jnp.zeros((2 * in_dim, 6 * H), f32)
        for gi in range(3):
            w = w.at[:in_dim, (2 * gi) * H:(2 * gi + 1) * H].set(
                w_f[:, gi * H:(gi + 1) * H])
            w = w.at[in_dim:, (2 * gi + 1) * H:(2 * gi + 2) * H].set(
                w_b[:, gi * H:(gi + 1) * H])
        return w

    w_ih_blk = fuse_blockdiag(params["w_ih_f"], params["w_ih_b"], E)   # (2E, 6H)
    w_hh_blk = fuse_blockdiag(params["w_hh_f"], params["w_hh_b"], H)   # (2H, 6H)

    # Fold b_ih (+ b_hh for r/z) into the hoisted input projection; only the n-gate
    # hidden-side bias must remain inside the r*(...) term.
    def bx_gate(suf, gi):
        bih = params[f"b_ih_{suf}"][:, gi * H:(gi + 1) * H]
        if gi < 2:
            return bih + params[f"b_hh_{suf}"][:, gi * H:(gi + 1) * H]
        return bih

    bx_all = jnp.concatenate(
        [bx_gate(s, gi) for gi in range(3) for s in ("f", "b")], axis=-1).astype(f32)
    bhn_all = jnp.concatenate(
        [params["b_hh_f"][:, 2 * H:], params["b_hh_b"][:, 2 * H:]], axis=-1).astype(f32)

    args = (x_cat.astype(md), w_ih_blk.astype(md), w_hh_blk.astype(md),
            bx_all, bhn_all, params["fc_w"].astype(md), params["fc_b"].astype(f32))

    vmem = pl.BlockSpec(memory_space=pltpu.MemorySpace.VMEM)
    out2, hidden = pl.pallas_call(
        encoder_kernel,
        out_shape=(jax.ShapeDtypeStruct((2 * T, B, H), f32),
                   jax.ShapeDtypeStruct((B, D), f32)),
        in_specs=[vmem] * len(args),
        out_specs=(vmem, vmem),
    )(*args)

    # Free layout plumbing in XLA outside the kernel: (2T,B,H) -> (T,B,2H) PyTorch layout.
    outputs = jnp.concatenate([out2[:T], out2[T:]], axis=-1)
    return outputs, hidden


# ------------------------------------------------------------------- pure-JAX reference
def encoder_ref(src, params):
    emb = jnp.take(params["embedding"], src, axis=0).astype(jnp.float32)
    T, B, _ = emb.shape
    H = params["w_hh_f"].shape[0]

    def run_gru(wih, whh, bih, bhh, xs):
        def step(h, x):
            gx = x @ wih + bih
            gh = h @ whh + bhh
            r = jax.nn.sigmoid(gx[:, :H] + gh[:, :H])
            z = jax.nn.sigmoid(gx[:, H:2 * H] + gh[:, H:2 * H])
            n = jnp.tanh(gx[:, 2 * H:] + r * gh[:, 2 * H:])
            h_new = (1.0 - z) * n + z * h
            return h_new, h_new
        h0 = jnp.zeros((B, H), jnp.float32)
        return jax.lax.scan(step, h0, xs)

    hf, out_f = run_gru(params["w_ih_f"], params["w_hh_f"],
                        params["b_ih_f"], params["b_hh_f"], emb)
    hb, out_b_rev = run_gru(params["w_ih_b"], params["w_hh_b"],
                            params["b_ih_b"], params["b_hh_b"], emb[::-1])
    out_b = out_b_rev[::-1]
    outputs = jnp.concatenate([out_f, out_b], axis=-1)
    hidden = jnp.tanh(jnp.concatenate([hf, hb], axis=1) @ params["fc_w"] + params["fc_b"])
    return outputs, hidden


# --------------------------------------------------------------------------- param init
def init_params(key, input_dim, emb_dim, enc_hid_dim, dec_hid_dim):
    ks = jax.random.split(key, 11)
    s = 0.1
    H = enc_hid_dim
    return {
        "embedding": jax.random.normal(ks[0], (input_dim, emb_dim), jnp.float32) * s,
        # forward GRU (weights transposed: (in, 3H)), PyTorch gate order [r|z|n]
        "w_ih_f": jax.random.normal(ks[1], (emb_dim, 3 * H), jnp.float32) * s,
        "w_hh_f": jax.random.normal(ks[2], (H, 3 * H), jnp.float32) * s,
        "b_ih_f": jax.random.normal(ks[3], (1, 3 * H), jnp.float32) * s,
        "b_hh_f": jax.random.normal(ks[4], (1, 3 * H), jnp.float32) * s,
        # backward GRU
        "w_ih_b": jax.random.normal(ks[5], (emb_dim, 3 * H), jnp.float32) * s,
        "w_hh_b": jax.random.normal(ks[6], (H, 3 * H), jnp.float32) * s,
        "b_ih_b": jax.random.normal(ks[7], (1, 3 * H), jnp.float32) * s,
        "b_hh_b": jax.random.normal(ks[8], (1, 3 * H), jnp.float32) * s,
        # fc: (2H -> dec_hid_dim)
        "fc_w": jax.random.normal(ks[9], (2 * H, dec_hid_dim), jnp.float32) * s,
        "fc_b": jax.random.normal(ks[10], (1, dec_hid_dim), jnp.float32) * s,
    }


# -------------------------------------------------------------------------------- main
if __name__ == "__main__":
    INPUT_DIM = 50      # vocab size
    EMB_DIM = 32
    ENC_HID_DIM = 32
    DEC_HID_DIM = 32
    SEQ_LEN = 8
    BATCH = 2
    # dropout = 0.0 -> identity (eval-mode semantics)

    key = jax.random.PRNGKey(0)
    k_src, k_param = jax.random.split(key)

    params = init_params(k_param, INPUT_DIM, EMB_DIM, ENC_HID_DIM, DEC_HID_DIM)
    src = jax.random.randint(k_src, (SEQ_LEN, BATCH), 0, INPUT_DIM, dtype=jnp.int32)

    ref_out, ref_hid = encoder_ref(src, params)

    # --- f32 matmul-operand path: exact-semantics check ---
    fwd_f32 = jax.jit(lambda s, p: encoder_forward(s, p, jnp.float32))
    outputs, hidden = fwd_f32(src, params)
    outputs = jax.block_until_ready(outputs)
    hidden = jax.block_until_ready(hidden)

    assert outputs.shape == (SEQ_LEN, BATCH, 2 * ENC_HID_DIM), outputs.shape
    assert hidden.shape == (BATCH, DEC_HID_DIM), hidden.shape
    assert jnp.allclose(outputs, ref_out, atol=1e-3, rtol=1e-3), "outputs mismatch (f32)"
    assert jnp.allclose(hidden, ref_hid, atol=1e-3, rtol=1e-3), "hidden mismatch (f32)"

    # --- default bf16 matmul-operand path (MXU-native on all gens); gate math f32 ---
    fwd_bf16 = jax.jit(lambda s, p: encoder_forward(s, p))
    out_bf, hid_bf = fwd_bf16(src, params)
    out_bf = jax.block_until_ready(out_bf)
    hid_bf = jax.block_until_ready(hid_bf)
    assert jnp.allclose(out_bf, ref_out, atol=2e-2, rtol=2e-2), "outputs mismatch (bf16)"
    assert jnp.allclose(hid_bf, ref_hid, atol=2e-2, rtol=2e-2), "hidden mismatch (bf16)"

    print("KERNEL_OK")
</pallas_src>

<mosaic_0001>
module attributes {stable_mosaic.version = 11 : i64} {
  func.func @encoder_kernel(%arg0: memref<16x64xf32, #tpu.memory_space<vmem>>, %arg1: memref<64x192xf32, #tpu.memory_space<vmem>>, %arg2: memref<64x192xf32, #tpu.memory_space<vmem>>, %arg3: memref<1x192xf32, #tpu.memory_space<vmem>>, %arg4: memref<1x64xf32, #tpu.memory_space<vmem>>, %arg5: memref<64x32xf32, #tpu.memory_space<vmem>>, %arg6: memref<1x32xf32, #tpu.memory_space<vmem>>, %arg7: memref<16x2x32xf32, #tpu.memory_space<vmem>>, %arg8: memref<2x32xf32, #tpu.memory_space<vmem>>) attributes {dimension_semantics = [], scalar_prefetch = 0 : i64, scratch_operands = 0 : i64, tpu.core_type = #tpu.core_type<tc>} {
    %c0 = arith.constant 0 : index
    %c0_0 = arith.constant 0 : index
    %0 = vector.load %arg0[%c0, %c0_0] : memref<16x64xf32, #tpu.memory_space<vmem>>, vector<16x64xf32>
    %c0_1 = arith.constant 0 : index
    %c0_2 = arith.constant 0 : index
    %1 = vector.load %arg1[%c0_1, %c0_2] : memref<64x192xf32, #tpu.memory_space<vmem>>, vector<64x192xf32>
    %cst = arith.constant dense<0.000000e+00> : vector<16x192xf32>
    %2 = tpu.matmul %0, %1, %cst {dimension_numbers = #tpu.dot_dimension_numbers<[1], [0], [0], [1], [0, 0, 1, 1], [], []>} : vector<16x64xf32>, vector<64x192xf32>, vector<16x192xf32> -> vector<16x192xf32>
    %c0_3 = arith.constant 0 : index
    %c0_4 = arith.constant 0 : index
    %3 = vector.load %arg3[%c0_3, %c0_4] : memref<1x192xf32, #tpu.memory_space<vmem>>, vector<1x192xf32>
    %4 = vector.broadcast %3 : vector<1x192xf32> to vector<16x192xf32>
    %5 = arith.addf %2, %4 : vector<16x192xf32>
    %c0_5 = arith.constant 0 : index
    %c0_6 = arith.constant 0 : index
    %6 = vector.load %arg2[%c0_5, %c0_6] : memref<64x192xf32, #tpu.memory_space<vmem>>, vector<64x192xf32>
    %c0_7 = arith.constant 0 : index
    %c0_8 = arith.constant 0 : index
    %7 = vector.load %arg4[%c0_7, %c0_8] : memref<1x64xf32, #tpu.memory_space<vmem>>, vector<1x64xf32>
    %cst_9 = arith.constant 0.000000e+00 : f32
    %8 = vector.broadcast %cst_9 : f32 to vector<2x64xf32>
    %cst_10 = arith.constant dense<0.000000e+00> : vector<2x192xf32>
    %9 = tpu.matmul %8, %6, %cst_10 {dimension_numbers = #tpu.dot_dimension_numbers<[1], [0], [0], [1], [0, 0, 1, 1], [], []>} : vector<2x64xf32>, vector<64x192xf32>, vector<2x192xf32> -> vector<2x192xf32>
    %10 = vector.extract_strided_slice %5 {offsets = [0, 0], sizes = [2, 192], strides = [1, 1]} : vector<16x192xf32> to vector<2x192xf32>
    %11 = vector.extract_strided_slice %10 {offsets = [0, 0], sizes = [2, 64], strides = [1, 1]} : vector<2x192xf32> to vector<2x64xf32>
    %12 = vector.extract_strided_slice %9 {offsets = [0, 0], sizes = [2, 64], strides = [1, 1]} : vector<2x192xf32> to vector<2x64xf32>
    %13 = arith.addf %11, %12 : vector<2x64xf32>
    %14 = arith.negf %13 : vector<2x64xf32>
    %15 = math.exp %14 : vector<2x64xf32>
    %cst_11 = arith.constant 1.000000e+00 : f32
    %16 = vector.broadcast %cst_11 : f32 to vector<2x64xf32>
    %17 = arith.addf %16, %15 : vector<2x64xf32>
    %18 = arith.divf %16, %17 : vector<2x64xf32>
    %19 = vector.extract_strided_slice %10 {offsets = [0, 64], sizes = [2, 64], strides = [1, 1]} : vector<2x192xf32> to vector<2x64xf32>
    %20 = vector.extract_strided_slice %9 {offsets = [0, 64], sizes = [2, 64], strides = [1, 1]} : vector<2x192xf32> to vector<2x64xf32>
    %21 = arith.addf %19, %20 : vector<2x64xf32>
    %22 = arith.negf %21 : vector<2x64xf32>
    %23 = math.exp %22 : vector<2x64xf32>
    %cst_12 = arith.constant 1.000000e+00 : f32
    %24 = vector.broadcast %cst_12 : f32 to vector<2x64xf32>
    %25 = arith.addf %24, %23 : vector<2x64xf32>
    %26 = arith.divf %24, %25 : vector<2x64xf32>
    %27 = vector.extract_strided_slice %10 {offsets = [0, 128], sizes = [2, 64], strides = [1, 1]} : vector<2x192xf32> to vector<2x64xf32>
    %28 = vector.extract_strided_slice %9 {offsets = [0, 128], sizes = [2, 64], strides = [1, 1]} : vector<2x192xf32> to vector<2x64xf32>
    %29 = vector.broadcast %7 : vector<1x64xf32> to vector<2x64xf32>
    %30 = arith.addf %28, %29 : vector<2x64xf32>
    %31 = arith.mulf %18, %30 : vector<2x64xf32>
    %32 = arith.addf %27, %31 : vector<2x64xf32>
    %33 = math.tanh %32 : vector<2x64xf32>
    %cst_13 = arith.constant 1.000000e+00 : f32
    %34 = vector.broadcast %cst_13 : f32 to vector<2x64xf32>
    %35 = arith.subf %34, %26 : vector<2x64xf32>
    %36 = arith.mulf %35, %33 : vector<2x64xf32>
    %37 = arith.mulf %26, %8 : vector<2x64xf32>
    %38 = arith.addf %36, %37 : vector<2x64xf32>
    %39 = vector.extract_strided_slice %38 {offsets = [0, 0], sizes = [2, 32], strides = [1, 1]} : vector<2x64xf32> to vector<2x32xf32>
    %c0_14 = arith.constant 0 : index
    %c0_15 = arith.constant 0 : index
    %c0_16 = arith.constant 0 : index
    %40 = vector.load %arg7[%c0_14, %c0_15, %c0_16] : memref<16x2x32xf32, #tpu.memory_space<vmem>>, vector<1x2x32xf32>
    %41 = vector.shape_cast %40 : vector<1x2x32xf32> to vector<2x32xf32>
    %42 = vector.shape_cast %39 : vector<2x32xf32> to vector<1x2x32xf32>
    tpu.vector_store %arg7[%c0_14, %c0_15, %c0_16], %42 {strides = array<i32>} : memref<16x2x32xf32, #tpu.memory_space<vmem>>, vector<1x2x32xf32>,
    %43 = vector.extract_strided_slice %38 {offsets = [0, 32], sizes = [2, 32], strides = [1, 1]} : vector<2x64xf32> to vector<2x32xf32>
    %c15 = arith.constant 15 : index
    %c0_17 = arith.constant 0 : index
    %c0_18 = arith.constant 0 : index
    %44 = vector.load %arg7[%c15, %c0_17, %c0_18] : memref<16x2x32xf32, #tpu.memory_space<vmem>>, vector<1x2x32xf32>
    %45 = vector.shape_cast %44 : vector<1x2x32xf32> to vector<2x32xf32>
    %46 = vector.shape_cast %43 : vector<2x32xf32> to vector<1x2x32xf32>
    tpu.vector_store %arg7[%c15, %c0_17, %c0_18], %46 {strides = array<i32>} : memref<16x2x32xf32, #tpu.memory_space<vmem>>, vector<1x2x32xf32>,
    %cst_19 = arith.constant dense<0.000000e+00> : vector<2x192xf32>
    %47 = tpu.matmul %38, %6, %cst_19 {dimension_numbers = #tpu.dot_dimension_numbers<[1], [0], [0], [1], [0, 0, 1, 1], [], []>} : vector<2x64xf32>, vector<64x192xf32>, vector<2x192xf32> -> vector<2x192xf32>
    %48 = vector.extract_strided_slice %5 {offsets = [2, 0], sizes = [2, 192], strides = [1, 1]} : vector<16x192xf32> to vector<2x192xf32>
    %49 = vector.extract_strided_slice %48 {offsets = [0, 0], sizes = [2, 64], strides = [1, 1]} : vector<2x192xf32> to vector<2x64xf32>
    %50 = vector.extract_strided_slice %47 {offsets = [0, 0], sizes = [2, 64], strides = [1, 1]} : vector<2x192xf32> to vector<2x64xf32>
    %51 = arith.addf %49, %50 : vector<2x64xf32>
    %52 = arith.negf %51 : vector<2x64xf32>
    %53 = math.exp %52 : vector<2x64xf32>
    %cst_20 = arith.constant 1.000000e+00 : f32
    %54 = vector.broadcast %cst_20 : f32 to vector<2x64xf32>
    %55 = arith.addf %54, %53 : vector<2x64xf32>
    %56 = arith.divf %54, %55 : vector<2x64xf32>
    %57 = vector.extract_strided_slice %48 {offsets = [0, 64], sizes = [2, 64], strides = [1, 1]} : vector<2x192xf32> to vector<2x64xf32>
    %58 = vector.extract_strided_slice %47 {offsets = [0, 64], sizes = [2, 64], strides = [1, 1]} : vector<2x192xf32> to vector<2x64xf32>
    %59 = arith.addf %57, %58 : vector<2x64xf32>
    %60 = arith.negf %59 : vector<2x64xf32>
    %61 = math.exp %60 : vector<2x64xf32>
    %cst_21 = arith.constant 1.000000e+00 : f32
    %62 = vector.broadcast %cst_21 : f32 to vector<2x64xf32>
    %63 = arith.addf %62, %61 : vector<2x64xf32>
    %64 = arith.divf %62, %63 : vector<2x64xf32>
    %65 = vector.extract_strided_slice %48 {offsets = [0, 128], sizes = [2, 64], strides = [1, 1]} : vector<2x192xf32> to vector<2x64xf32>
    %66 = vector.extract_strided_slice %47 {offsets = [0, 128], sizes = [2, 64], strides = [1, 1]} : vector<2x192xf32> to vector<2x64xf32>
    %67 = vector.broadcast %7 : vector<1x64xf32> to vector<2x64xf32>
    %68 = arith.addf %66, %67 : vector<2x64xf32>
    %69 = arith.mulf %56, %68 : vector<2x64xf32>
    %70 = arith.addf %65, %69 : vector<2x64xf32>
    %71 = math.tanh %70 : vector<2x64xf32>
    %cst_22 = arith.constant 1.000000e+00 : f32
    %72 = vector.broadcast %cst_22 : f32 to vector<2x64xf32>
    %73 = arith.subf %72, %64 : vector<2x64xf32>
    %74 = arith.mulf %73, %71 : vector<2x64xf32>
    %75 = arith.mulf %64, %38 : vector<2x64xf32>
    %76 = arith.addf %74, %75 : vector<2x64xf32>
    %77 = vector.extract_strided_slice %76 {offsets = [0, 0], sizes = [2, 32], strides = [1, 1]} : vector<2x64xf32> to vector<2x32xf32>
    %c1 = arith.constant 1 : index
    %c0_23 = arith.constant 0 : index
    %c0_24 = arith.constant 0 : index
    %78 = vector.load %arg7[%c1, %c0_23, %c0_24] : memref<16x2x32xf32, #tpu.memory_space<vmem>>, vector<1x2x32xf32>
    %79 = vector.shape_cast %78 : vector<1x2x32xf32> to vector<2x32xf32>
    %80 = vector.shape_cast %77 : vector<2x32xf32> to vector<1x2x32xf32>
    tpu.vector_store %arg7[%c1, %c0_23, %c0_24], %80 {strides = array<i32>} : memref<16x2x32xf32, #tpu.memory_space<vmem>>, vector<1x2x32xf32>,
    %81 = vector.extract_strided_slice %76 {offsets = [0, 32], sizes = [2, 32], strides = [1, 1]} : vector<2x64xf32> to vector<2x32xf32>
    %c14 = arith.constant 14 : index
    %c0_25 = arith.constant 0 : index
    %c0_26 = arith.constant 0 : index
    %82 = vector.load %arg7[%c14, %c0_25, %c0_26] : memref<16x2x32xf32, #tpu.memory_space<vmem>>, vector<1x2x32xf32>
    %83 = vector.shape_cast %82 : vector<1x2x32xf32> to vector<2x32xf32>
    %84 = vector.shape_cast %81 : vector<2x32xf32> to vector<1x2x32xf32>
    tpu.vector_store %arg7[%c14, %c0_25, %c0_26], %84 {strides = array<i32>} : memref<16x2x32xf32, #tpu.memory_space<vmem>>, vector<1x2x32xf32>,
    %cst_27 = arith.constant dense<0.000000e+00> : vector<2x192xf32>
    %85 = tpu.matmul %76, %6, %cst_27 {dimension_numbers = #tpu.dot_dimension_numbers<[1], [0], [0], [1], [0, 0, 1, 1], [], []>} : vector<2x64xf32>, vector<64x192xf32>, vector<2x192xf32> -> vector<2x192xf32>
    %86 = vector.extract_strided_slice %5 {offsets = [4, 0], sizes = [2, 192], strides = [1, 1]} : vector<16x192xf32> to vector<2x192xf32>
    %87 = vector.extract_strided_slice %86 {offsets = [0, 0], sizes = [2, 64], strides = [1, 1]} : vector<2x192xf32> to vector<2x64xf32>
    %88 = vector.extract_strided_slice %85 {offsets = [0, 0], sizes = [2, 64], strides = [1, 1]} : vector<2x192xf32> to vector<2x64xf32>
    %89 = arith.addf %87, %88 : vector<2x64xf32>
    %90 = arith.negf %89 : vector<2x64xf32>
    %91 = math.exp %90 : vector<2x64xf32>
    %cst_28 = arith.constant 1.000000e+00 : f32
    %92 = vector.broadcast %cst_28 : f32 to vector<2x64xf32>
    %93 = arith.addf %92, %91 : vector<2x64xf32>
    %94 = arith.divf %92, %93 : vector<2x64xf32>
    %95 = vector.extract_strided_slice %86 {offsets = [0, 64], sizes = [2, 64], strides = [1, 1]} : vector<2x192xf32> to vector<2x64xf32>
    %96 = vector.extract_strided_slice %85 {offsets = [0, 64], sizes = [2, 64], strides = [1, 1]} : vector<2x192xf32> to vector<2x64xf32>
    %97 = arith.addf %95, %96 : vector<2x64xf32>
    %98 = arith.negf %97 : vector<2x64xf32>
    %99 = math.exp %98 : vector<2x64xf32>
    %cst_29 = arith.constant 1.000000e+00 : f32
    %100 = vector.broadcast %cst_29 : f32 to vector<2x64xf32>
    %101 = arith.addf %100, %99 : vector<2x64xf32>
    %102 = arith.divf %100, %101 : vector<2x64xf32>
    %103 = vector.extract_strided_slice %86 {offsets = [0, 128], sizes = [2, 64], strides = [1, 1]} : vector<2x192xf32> to vector<2x64xf32>
    %104 = vector.extract_strided_slice %85 {offsets = [0, 128], sizes = [2, 64], strides = [1, 1]} : vector<2x192xf32> to vector<2x64xf32>
    %105 = vector.broadcast %7 : vector<1x64xf32> to vector<2x64xf32>
    %106 = arith.addf %104, %105 : vector<2x64xf32>
    %107 = arith.mulf %94, %106 : vector<2x64xf32>
    %108 = arith.addf %103, %107 : vector<2x64xf32>
    %109 = math.tanh %108 : vector<2x64xf32>
    %cst_30 = arith.constant 1.000000e+00 : f32
    %110 = vector.broadcast %cst_30 : f32 to vector<2x64xf32>
    %111 = arith.subf %110, %102 : vector<2x64xf32>
    %112 = arith.mulf %111, %109 : vector<2x64xf32>
    %113 = arith.mulf %102, %76 : vector<2x64xf32>
    %114 = arith.addf %112, %113 : vector<2x64xf32>
    %115 = vector.extract_strided_slice %114 {offsets = [0, 0], sizes = [2, 32], strides = [1, 1]} : vector<2x64xf32> to vector<2x32xf32>
    %c2 = arith.constant 2 : index
    %c0_31 = arith.constant 0 : index
    %c0_32 = arith.constant 0 : index
    %116 = vector.load %arg7[%c2, %c0_31, %c0_32] : memref<16x2x32xf32, #tpu.memory_space<vmem>>, vector<1x2x32xf32>
    %117 = vector.shape_cast %116 : vector<1x2x32xf32> to vector<2x32xf32>
    %118 = vector.shape_cast %115 : vector<2x32xf32> to vector<1x2x32xf32>
    tpu.vector_store %arg7[%c2, %c0_31, %c0_32], %118 {strides = array<i32>} : memref<16x2x32xf32, #tpu.memory_space<vmem>>, vector<1x2x32xf32>,
    %119 = vector.extract_strided_slice %114 {offsets = [0, 32], sizes = [2, 32], strides = [1, 1]} : vector<2x64xf32> to vector<2x32xf32>
    %c13 = arith.constant 13 : index
    %c0_33 = arith.constant 0 : index
    %c0_34 = arith.constant 0 : index
    %120 = vector.load %arg7[%c13, %c0_33, %c0_34] : memref<16x2x32xf32, #tpu.memory_space<vmem>>, vector<1x2x32xf32>
    %121 = vector.shape_cast %120 : vector<1x2x32xf32> to vector<2x32xf32>
    %122 = vector.shape_cast %119 : vector<2x32xf32> to vector<1x2x32xf32>
    tpu.vector_store %arg7[%c13, %c0_33, %c0_34], %122 {strides = array<i32>} : memref<16x2x32xf32, #tpu.memory_space<vmem>>, vector<1x2x32xf32>,
    %cst_35 = arith.constant dense<0.000000e+00> : vector<2x192xf32>
    %123 = tpu.matmul %114, %6, %cst_35 {dimension_numbers = #tpu.dot_dimension_numbers<[1], [0], [0], [1], [0, 0, 1, 1], [], []>} : vector<2x64xf32>, vector<64x192xf32>, vector<2x192xf32> -> vector<2x192xf32>
    %124 = vector.extract_strided_slice %5 {offsets = [6, 0], sizes = [2, 192], strides = [1, 1]} : vector<16x192xf32> to vector<2x192xf32>
    %125 = vector.extract_strided_slice %124 {offsets = [0, 0], sizes = [2, 64], strides = [1, 1]} : vector<2x192xf32> to vector<2x64xf32>
    %126 = vector.extract_strided_slice %123 {offsets = [0, 0], sizes = [2, 64], strides = [1, 1]} : vector<2x192xf32> to vector<2x64xf32>
    %127 = arith.addf %125, %126 : vector<2x64xf32>
    %128 = arith.negf %127 : vector<2x64xf32>
    %129 = math.exp %128 : vector<2x64xf32>
    %cst_36 = arith.constant 1.000000e+00 : f32
    %130 = vector.broadcast %cst_36 : f32 to vector<2x64xf32>
    %131 = arith.addf %130, %129 : vector<2x64xf32>
    %132 = arith.divf %130, %131 : vector<2x64xf32>
    %133 = vector.extract_strided_slice %124 {offsets = [0, 64], sizes = [2, 64], strides = [1, 1]} : vector<2x192xf32> to vector<2x64xf32>
    %134 = vector.extract_strided_slice %123 {offsets = [0, 64], sizes = [2, 64], strides = [1, 1]} : vector<2x192xf32> to vector<2x64xf32>
    %135 = arith.addf %133, %134 : vector<2x64xf32>
    %136 = arith.negf %135 : vector<2x64xf32>
    %137 = math.exp %136 : vector<2x64xf32>
    %cst_37 = arith.constant 1.000000e+00 : f32
    %138 = vector.broadcast %cst_37 : f32 to vector<2x64xf32>
    %139 = arith.addf %138, %137 : vector<2x64xf32>
    %140 = arith.divf %138, %139 : vector<2x64xf32>
    %141 = vector.extract_strided_slice %124 {offsets = [0, 128], sizes = [2, 64], strides = [1, 1]} : vector<2x192xf32> to vector<2x64xf32>
    %142 = vector.extract_strided_slice %123 {offsets = [0, 128], sizes = [2, 64], strides = [1, 1]} : vector<2x192xf32> to vector<2x64xf32>
    %143 = vector.broadcast %7 : vector<1x64xf32> to vector<2x64xf32>
    %144 = arith.addf %142, %143 : vector<2x64xf32>
    %145 = arith.mulf %132, %144 : vector<2x64xf32>
    %146 = arith.addf %141, %145 : vector<2x64xf32>
    %147 = math.tanh %146 : vector<2x64xf32>
    %cst_38 = arith.constant 1.000000e+00 : f32
    %148 = vector.broadcast %cst_38 : f32 to vector<2x64xf32>
    %149 = arith.subf %148, %140 : vector<2x64xf32>
    %150 = arith.mulf %149, %147 : vector<2x64xf32>
    %151 = arith.mulf %140, %114 : vector<2x64xf32>
    %152 = arith.addf %150, %151 : vector<2x64xf32>
    %153 = vector.extract_strided_slice %152 {offsets = [0, 0], sizes = [2, 32], strides = [1, 1]} : vector<2x64xf32> to vector<2x32xf32>
    %c3 = arith.constant 3 : index
    %c0_39 = arith.constant 0 : index
    %c0_40 = arith.constant 0 : index
    %154 = vector.load %arg7[%c3, %c0_39, %c0_40] : memref<16x2x32xf32, #tpu.memory_space<vmem>>, vector<1x2x32xf32>
    %155 = vector.shape_cast %154 : vector<1x2x32xf32> to vector<2x32xf32>
    %156 = vector.shape_cast %153 : vector<2x32xf32> to vector<1x2x32xf32>
    tpu.vector_store %arg7[%c3, %c0_39, %c0_40], %156 {strides = array<i32>} : memref<16x2x32xf32, #tpu.memory_space<vmem>>, vector<1x2x32xf32>,
    %157 = vector.extract_strided_slice %152 {offsets = [0, 32], sizes = [2, 32], strides = [1, 1]} : vector<2x64xf32> to vector<2x32xf32>
    %c12 = arith.constant 12 : index
    %c0_41 = arith.constant 0 : index
    %c0_42 = arith.constant 0 : index
    %158 = vector.load %arg7[%c12, %c0_41, %c0_42] : memref<16x2x32xf32, #tpu.memory_space<vmem>>, vector<1x2x32xf32>
    %159 = vector.shape_cast %158 : vector<1x2x32xf32> to vector<2x32xf32>
    %160 = vector.shape_cast %157 : vector<2x32xf32> to vector<1x2x32xf32>
    tpu.vector_store %arg7[%c12, %c0_41, %c0_42], %160 {strides = array<i32>} : memref<16x2x32xf32, #tpu.memory_space<vmem>>, vector<1x2x32xf32>,
    %cst_43 = arith.constant dense<0.000000e+00> : vector<2x192xf32>
    %161 = tpu.matmul %152, %6, %cst_43 {dimension_numbers = #tpu.dot_dimension_numbers<[1], [0], [0], [1], [0, 0, 1, 1], [], []>} : vector<2x64xf32>, vector<64x192xf32>, vector<2x192xf32> -> vector<2x192xf32>
    %162 = vector.extract_strided_slice %5 {offsets = [8, 0], sizes = [2, 192], strides = [1, 1]} : vector<16x192xf32> to vector<2x192xf32>
    %163 = vector.extract_strided_slice %162 {offsets = [0, 0], sizes = [2, 64], strides = [1, 1]} : vector<2x192xf32> to vector<2x64xf32>
    %164 = vector.extract_strided_slice %161 {offsets = [0, 0], sizes = [2, 64], strides = [1, 1]} : vector<2x192xf32> to vector<2x64xf32>
    %165 = arith.addf %163, %164 : vector<2x64xf32>
    %166 = arith.negf %165 : vector<2x64xf32>
    %167 = math.exp %166 : vector<2x64xf32>
    %cst_44 = arith.constant 1.000000e+00 : f32
    %168 = vector.broadcast %cst_44 : f32 to vector<2x64xf32>
    %169 = arith.addf %168, %167 : vector<2x64xf32>
    %170 = arith.divf %168, %169 : vector<2x64xf32>
    %171 = vector.extract_strided_slice %162 {offsets = [0, 64], sizes = [2, 64], strides = [1, 1]} : vector<2x192xf32> to vector<2x64xf32>
    %172 = vector.extract_strided_slice %161 {offsets = [0, 64], sizes = [2, 64], strides = [1, 1]} : vector<2x192xf32> to vector<2x64xf32>
    %173 = arith.addf %171, %172 : vector<2x64xf32>
    %174 = arith.negf %173 : vector<2x64xf32>
    %175 = math.exp %174 : vector<2x64xf32>
    %cst_45 = arith.constant 1.000000e+00 : f32
    %176 = vector.broadcast %cst_45 : f32 to vector<2x64xf32>
    %177 = arith.addf %176, %175 : vector<2x64xf32>
    %178 = arith.divf %176, %177 : vector<2x64xf32>
    %179 = vector.extract_strided_slice %162 {offsets = [0, 128], sizes = [2, 64], strides = [1, 1]} : vector<2x192xf32> to vector<2x64xf32>
    %180 = vector.extract_strided_slice %161 {offsets = [0, 128], sizes = [2, 64], strides = [1, 1]} : vector<2x192xf32> to vector<2x64xf32>
    %181 = vector.broadcast %7 : vector<1x64xf32> to vector<2x64xf32>
    %182 = arith.addf %180, %181 : vector<2x64xf32>
    %183 = arith.mulf %170, %182 : vector<2x64xf32>
    %184 = arith.addf %179, %183 : vector<2x64xf32>
    %185 = math.tanh %184 : vector<2x64xf32>
    %cst_46 = arith.constant 1.000000e+00 : f32
    %186 = vector.broadcast %cst_46 : f32 to vector<2x64xf32>
    %187 = arith.subf %186, %178 : vector<2x64xf32>
    %188 = arith.mulf %187, %185 : vector<2x64xf32>
    %189 = arith.mulf %178, %152 : vector<2x64xf32>
    %190 = arith.addf %188, %189 : vector<2x64xf32>
    %191 = vector.extract_strided_slice %190 {offsets = [0, 0], sizes = [2, 32], strides = [1, 1]} : vector<2x64xf32> to vector<2x32xf32>
    %c4 = arith.constant 4 : index
    %c0_47 = arith.constant 0 : index
    %c0_48 = arith.constant 0 : index
    %192 = vector.load %arg7[%c4, %c0_47, %c0_48] : memref<16x2x32xf32, #tpu.memory_space<vmem>>, vector<1x2x32xf32>
    %193 = vector.shape_cast %192 : vector<1x2x32xf32> to vector<2x32xf32>
    %194 = vector.shape_cast %191 : vector<2x32xf32> to vector<1x2x32xf32>
    tpu.vector_store %arg7[%c4, %c0_47, %c0_48], %194 {strides = array<i32>} : memref<16x2x32xf32, #tpu.memory_space<vmem>>, vector<1x2x32xf32>,
    %195 = vector.extract_strided_slice %190 {offsets = [0, 32], sizes = [2, 32], strides = [1, 1]} : vector<2x64xf32> to vector<2x32xf32>
    %c11 = arith.constant 11 : index
    %c0_49 = arith.constant 0 : index
    %c0_50 = arith.constant 0 : index
    %196 = vector.load %arg7[%c11, %c0_49, %c0_50] : memref<16x2x32xf32, #tpu.memory_space<vmem>>, vector<1x2x32xf32>
    %197 = vector.shape_cast %196 : vector<1x2x32xf32> to vector<2x32xf32>
    %198 = vector.shape_cast %195 : vector<2x32xf32> to vector<1x2x32xf32>
    tpu.vector_store %arg7[%c11, %c0_49, %c0_50], %198 {strides = array<i32>} : memref<16x2x32xf32, #tpu.memory_space<vmem>>, vector<1x2x32xf32>,
    %cst_51 = arith.constant dense<0.000000e+00> : vector<2x192xf32>
    %199 = tpu.matmul %190, %6, %cst_51 {dimension_numbers = #tpu.dot_dimension_numbers<[1], [0], [0], [1], [0, 0, 1, 1], [], []>} : vector<2x64xf32>, vector<64x192xf32>, vector<2x192xf32> -> vector<2x192xf32>
    %200 = vector.extract_strided_slice %5 {offsets = [10, 0], sizes = [2, 192], strides = [1, 1]} : vector<16x192xf32> to vector<2x192xf32>
    %201 = vector.extract_strided_slice %200 {offsets = [0, 0], sizes = [2, 64], strides = [1, 1]} : vector<2x192xf32> to vector<2x64xf32>
    %202 = vector.extract_strided_slice %199 {offsets = [0, 0], sizes = [2, 64], strides = [1, 1]} : vector<2x192xf32> to vector<2x64xf32>
    %203 = arith.addf %201, %202 : vector<2x64xf32>
    %204 = arith.negf %203 : vector<2x64xf32>
    %205 = math.exp %204 : vector<2x64xf32>
    %cst_52 = arith.constant 1.000000e+00 : f32
    %206 = vector.broadcast %cst_52 : f32 to vector<2x64xf32>
    %207 = arith.addf %206, %205 : vector<2x64xf32>
    %208 = arith.divf %206, %207 : vector<2x64xf32>
    %209 = vector.extract_strided_slice %200 {offsets = [0, 64], sizes = [2, 64], strides = [1, 1]} : vector<2x192xf32> to vector<2x64xf32>
    %210 = vector.extract_strided_slice %199 {offsets = [0, 64], sizes = [2, 64], strides = [1, 1]} : vector<2x192xf32> to vector<2x64xf32>
    %211 = arith.addf %209, %210 : vector<2x64xf32>
    %212 = arith.negf %211 : vector<2x64xf32>
    %213 = math.exp %212 : vector<2x64xf32>
    %cst_53 = arith.constant 1.000000e+00 : f32
    %214 = vector.broadcast %cst_53 : f32 to vector<2x64xf32>
    %215 = arith.addf %214, %213 : vector<2x64xf32>
    %216 = arith.divf %214, %215 : vector<2x64xf32>
    %217 = vector.extract_strided_slice %200 {offsets = [0, 128], sizes = [2, 64], strides = [1, 1]} : vector<2x192xf32> to vector<2x64xf32>
    %218 = vector.extract_strided_slice %199 {offsets = [0, 128], sizes = [2, 64], strides = [1, 1]} : vector<2x192xf32> to vector<2x64xf32>
    %219 = vector.broadcast %7 : vector<1x64xf32> to vector<2x64xf32>
    %220 = arith.addf %218, %219 : vector<2x64xf32>
    %221 = arith.mulf %208, %220 : vector<2x64xf32>
    %222 = arith.addf %217, %221 : vector<2x64xf32>
    %223 = math.tanh %222 : vector<2x64xf32>
    %cst_54 = arith.constant 1.000000e+00 : f32
    %224 = vector.broadcast %cst_54 : f32 to vector<2x64xf32>
    %225 = arith.subf %224, %216 : vector<2x64xf32>
    %226 = arith.mulf %225, %223 : vector<2x64xf32>
    %227 = arith.mulf %216, %190 : vector<2x64xf32>
    %228 = arith.addf %226, %227 : vector<2x64xf32>
    %229 = vector.extract_strided_slice %228 {offsets = [0, 0], sizes = [2, 32], strides = [1, 1]} : vector<2x64xf32> to vector<2x32xf32>
    %c5 = arith.constant 5 : index
    %c0_55 = arith.constant 0 : index
    %c0_56 = arith.constant 0 : index
    %230 = vector.load %arg7[%c5, %c0_55, %c0_56] : memref<16x2x32xf32, #tpu.memory_space<vmem>>, vector<1x2x32xf32>
    %231 = vector.shape_cast %230 : vector<1x2x32xf32> to vector<2x32xf32>
    %232 = vector.shape_cast %229 : vector<2x32xf32> to vector<1x2x32xf32>
    tpu.vector_store %arg7[%c5, %c0_55, %c0_56], %232 {strides = array<i32>} : memref<16x2x32xf32, #tpu.memory_space<vmem>>, vector<1x2x32xf32>,
    %233 = vector.extract_strided_slice %228 {offsets = [0, 32], sizes = [2, 32], strides = [1, 1]} : vector<2x64xf32> to vector<2x32xf32>
    %c10 = arith.constant 10 : index
    %c0_57 = arith.constant 0 : index
    %c0_58 = arith.constant 0 : index
    %234 = vector.load %arg7[%c10, %c0_57, %c0_58] : memref<16x2x32xf32, #tpu.memory_space<vmem>>, vector<1x2x32xf32>
    %235 = vector.shape_cast %234 : vector<1x2x32xf32> to vector<2x32xf32>
    %236 = vector.shape_cast %233 : vector<2x32xf32> to vector<1x2x32xf32>
    tpu.vector_store %arg7[%c10, %c0_57, %c0_58], %236 {strides = array<i32>} : memref<16x2x32xf32, #tpu.memory_space<vmem>>, vector<1x2x32xf32>,
    %cst_59 = arith.constant dense<0.000000e+00> : vector<2x192xf32>
    %237 = tpu.matmul %228, %6, %cst_59 {dimension_numbers = #tpu.dot_dimension_numbers<[1], [0], [0], [1], [0, 0, 1, 1], [], []>} : vector<2x64xf32>, vector<64x192xf32>, vector<2x192xf32> -> vector<2x192xf32>
    %238 = vector.extract_strided_slice %5 {offsets = [12, 0], sizes = [2, 192], strides = [1, 1]} : vector<16x192xf32> to vector<2x192xf32>
    %239 = vector.extract_strided_slice %238 {offsets = [0, 0], sizes = [2, 64], strides = [1, 1]} : vector<2x192xf32> to vector<2x64xf32>
    %240 = vector.extract_strided_slice %237 {offsets = [0, 0], sizes = [2, 64], strides = [1, 1]} : vector<2x192xf32> to vector<2x64xf32>
    %241 = arith.addf %239, %240 : vector<2x64xf32>
    %242 = arith.negf %241 : vector<2x64xf32>
    %243 = math.exp %242 : vector<2x64xf32>
    %cst_60 = arith.constant 1.000000e+00 : f32
    %244 = vector.broadcast %cst_60 : f32 to vector<2x64xf32>
    %245 = arith.addf %244, %243 : vector<2x64xf32>
    %246 = arith.divf %244, %245 : vector<2x64xf32>
    %247 = vector.extract_strided_slice %238 {offsets = [0, 64], sizes = [2, 64], strides = [1, 1]} : vector<2x192xf32> to vector<2x64xf32>
    %248 = vector.extract_strided_slice %237 {offsets = [0, 64], sizes = [2, 64], strides = [1, 1]} : vector<2x192xf32> to vector<2x64xf32>
    %249 = arith.addf %247, %248 : vector<2x64xf32>
    %250 = arith.negf %249 : vector<2x64xf32>
    %251 = math.exp %250 : vector<2x64xf32>
    %cst_61 = arith.constant 1.000000e+00 : f32
    %252 = vector.broadcast %cst_61 : f32 to vector<2x64xf32>
    %253 = arith.addf %252, %251 : vector<2x64xf32>
    %254 = arith.divf %252, %253 : vector<2x64xf32>
    %255 = vector.extract_strided_slice %238 {offsets = [0, 128], sizes = [2, 64], strides = [1, 1]} : vector<2x192xf32> to vector<2x64xf32>
    %256 = vector.extract_strided_slice %237 {offsets = [0, 128], sizes = [2, 64], strides = [1, 1]} : vector<2x192xf32> to vector<2x64xf32>
    %257 = vector.broadcast %7 : vector<1x64xf32> to vector<2x64xf32>
    %258 = arith.addf %256, %257 : vector<2x64xf32>
    %259 = arith.mulf %246, %258 : vector<2x64xf32>
    %260 = arith.addf %255, %259 : vector<2x64xf32>
    %261 = math.tanh %260 : vector<2x64xf32>
    %cst_62 = arith.constant 1.000000e+00 : f32
    %262 = vector.broadcast %cst_62 : f32 to vector<2x64xf32>
    %263 = arith.subf %262, %254 : vector<2x64xf32>
    %264 = arith.mulf %263, %261 : vector<2x64xf32>
    %265 = arith.mulf %254, %228 : vector<2x64xf32>
    %266 = arith.addf %264, %265 : vector<2x64xf32>
    %267 = vector.extract_strided_slice %266 {offsets = [0, 0], sizes = [2, 32], strides = [1, 1]} : vector<2x64xf32> to vector<2x32xf32>
    %c6 = arith.constant 6 : index
    %c0_63 = arith.constant 0 : index
    %c0_64 = arith.constant 0 : index
    %268 = vector.load %arg7[%c6, %c0_63, %c0_64] : memref<16x2x32xf32, #tpu.memory_space<vmem>>, vector<1x2x32xf32>
    %269 = vector.shape_cast %268 : vector<1x2x32xf32> to vector<2x32xf32>
    %270 = vector.shape_cast %267 : vector<2x32xf32> to vector<1x2x32xf32>
    tpu.vector_store %arg7[%c6, %c0_63, %c0_64], %270 {strides = array<i32>} : memref<16x2x32xf32, #tpu.memory_space<vmem>>, vector<1x2x32xf32>,
    %271 = vector.extract_strided_slice %266 {offsets = [0, 32], sizes = [2, 32], strides = [1, 1]} : vector<2x64xf32> to vector<2x32xf32>
    %c9 = arith.constant 9 : index
    %c0_65 = arith.constant 0 : index
    %c0_66 = arith.constant 0 : index
    %272 = vector.load %arg7[%c9, %c0_65, %c0_66] : memref<16x2x32xf32, #tpu.memory_space<vmem>>, vector<1x2x32xf32>
    %273 = vector.shape_cast %272 : vector<1x2x32xf32> to vector<2x32xf32>
    %274 = vector.shape_cast %271 : vector<2x32xf32> to vector<1x2x32xf32>
    tpu.vector_store %arg7[%c9, %c0_65, %c0_66], %274 {strides = array<i32>} : memref<16x2x32xf32, #tpu.memory_space<vmem>>, vector<1x2x32xf32>,
    %cst_67 = arith.constant dense<0.000000e+00> : vector<2x192xf32>
    %275 = tpu.matmul %266, %6, %cst_67 {dimension_numbers = #tpu.dot_dimension_numbers<[1], [0], [0], [1], [0, 0, 1, 1], [], []>} : vector<2x64xf32>, vector<64x192xf32>, vector<2x192xf32> -> vector<2x192xf32>
    %276 = vector.extract_strided_slice %5 {offsets = [14, 0], sizes = [2, 192], strides = [1, 1]} : vector<16x192xf32> to vector<2x192xf32>
    %277 = vector.extract_strided_slice %276 {offsets = [0, 0], sizes = [2, 64], strides = [1, 1]} : vector<2x192xf32> to vector<2x64xf32>
    %278 = vector.extract_strided_slice %275 {offsets = [0, 0], sizes = [2, 64], strides = [1, 1]} : vector<2x192xf32> to vector<2x64xf32>
    %279 = arith.addf %277, %278 : vector<2x64xf32>
    %280 = arith.negf %279 : vector<2x64xf32>
    %281 = math.exp %280 : vector<2x64xf32>
    %cst_68 = arith.constant 1.000000e+00 : f32
    %282 = vector.broadcast %cst_68 : f32 to vector<2x64xf32>
    %283 = arith.addf %282, %281 : vector<2x64xf32>
    %284 = arith.divf %282, %283 : vector<2x64xf32>
    %285 = vector.extract_strided_slice %276 {offsets = [0, 64], sizes = [2, 64], strides = [1, 1]} : vector<2x192xf32> to vector<2x64xf32>
    %286 = vector.extract_strided_slice %275 {offsets = [0, 64], sizes = [2, 64], strides = [1, 1]} : vector<2x192xf32> to vector<2x64xf32>
    %287 = arith.addf %285, %286 : vector<2x64xf32>
    %288 = arith.negf %287 : vector<2x64xf32>
    %289 = math.exp %288 : vector<2x64xf32>
    %cst_69 = arith.constant 1.000000e+00 : f32
    %290 = vector.broadcast %cst_69 : f32 to vector<2x64xf32>
    %291 = arith.addf %290, %289 : vector<2x64xf32>
    %292 = arith.divf %290, %291 : vector<2x64xf32>
    %293 = vector.extract_strided_slice %276 {offsets = [0, 128], sizes = [2, 64], strides = [1, 1]} : vector<2x192xf32> to vector<2x64xf32>
    %294 = vector.extract_strided_slice %275 {offsets = [0, 128], sizes = [2, 64], strides = [1, 1]} : vector<2x192xf32> to vector<2x64xf32>
    %295 = vector.broadcast %7 : vector<1x64xf32> to vector<2x64xf32>
    %296 = arith.addf %294, %295 : vector<2x64xf32>
    %297 = arith.mulf %284, %296 : vector<2x64xf32>
    %298 = arith.addf %293, %297 : vector<2x64xf32>
    %299 = math.tanh %298 : vector<2x64xf32>
    %cst_70 = arith.constant 1.000000e+00 : f32
    %300 = vector.broadcast %cst_70 : f32 to vector<2x64xf32>
    %301 = arith.subf %300, %292 : vector<2x64xf32>
    %302 = arith.mulf %301, %299 : vector<2x64xf32>
    %303 = arith.mulf %292, %266 : vector<2x64xf32>
    %304 = arith.addf %302, %303 : vector<2x64xf32>
    %305 = vector.extract_strided_slice %304 {offsets = [0, 0], sizes = [2, 32], strides = [1, 1]} : vector<2x64xf32> to vector<2x32xf32>
    %c7 = arith.constant 7 : index
    %c0_71 = arith.constant 0 : index
    %c0_72 = arith.constant 0 : index
    %306 = vector.load %arg7[%c7, %c0_71, %c0_72] : memref<16x2x32xf32, #tpu.memory_space<vmem>>, vector<1x2x32xf32>
    %307 = vector.shape_cast %306 : vector<1x2x32xf32> to vector<2x32xf32>
    %308 = vector.shape_cast %305 : vector<2x32xf32> to vector<1x2x32xf32>
    tpu.vector_store %arg7[%c7, %c0_71, %c0_72], %308 {strides = array<i32>} : memref<16x2x32xf32, #tpu.memory_space<vmem>>, vector<1x2x32xf32>,
    %309 = vector.extract_strided_slice %304 {offsets = [0, 32], sizes = [2, 32], strides = [1, 1]} : vector<2x64xf32> to vector<2x32xf32>
    %c8 = arith.constant 8 : index
    %c0_73 = arith.constant 0 : index
    %c0_74 = arith.constant 0 : index
    %310 = vector.load %arg7[%c8, %c0_73, %c0_74] : memref<16x2x32xf32, #tpu.memory_space<vmem>>, vector<1x2x32xf32>
    %311 = vector.shape_cast %310 : vector<1x2x32xf32> to vector<2x32xf32>
    %312 = vector.shape_cast %309 : vector<2x32xf32> to vector<1x2x32xf32>
    tpu.vector_store %arg7[%c8, %c0_73, %c0_74], %312 {strides = array<i32>} : memref<16x2x32xf32, #tpu.memory_space<vmem>>, vector<1x2x32xf32>,
    %c0_75 = arith.constant 0 : index
    %c0_76 = arith.constant 0 : index
    %313 = vector.load %arg5[%c0_75, %c0_76] : memref<64x32xf32, #tpu.memory_space<vmem>>, vector<64x32xf32>
    %cst_77 = arith.constant dense<0.000000e+00> : vector<2x32xf32>
    %314 = tpu.matmul %304, %313, %cst_77 {dimension_numbers = #tpu.dot_dimension_numbers<[1], [0], [0], [1], [0, 0, 1, 1], [], []>} : vector<2x64xf32>, vector<64x32xf32>, vector<2x32xf32> -> vector<2x32xf32>
    %c0_78 = arith.constant 0 : index
    %c0_79 = arith.constant 0 : index
    %315 = vector.load %arg6[%c0_78, %c0_79] : memref<1x32xf32, #tpu.memory_space<vmem>>, vector<1x32xf32>
    %316 = vector.broadcast %315 : vector<1x32xf32> to vector<2x32xf32>
    %317 = arith.addf %314, %316 : vector<2x32xf32>
    %318 = math.tanh %317 : vector<2x32xf32>
    %c0_80 = arith.constant 0 : index
    %c0_81 = arith.constant 0 : index
    %319 = vector.load %arg8[%c0_80, %c0_81] : memref<2x32xf32, #tpu.memory_space<vmem>>, vector<2x32xf32>
    tpu.vector_store %arg8[%c0_80, %c0_81], %318 {strides = array<i32>} : memref<2x32xf32, #tpu.memory_space<vmem>>, vector<2x32xf32>,
    return
  }
}

</mosaic_0001>

<bundles_post_ra>
// kernel: _lambda_.1
= control target key start
LH: loop header
LB: loop body
LE: loop exit
PB: predicated region body
PF: predicated region fallthrough
CT: control target
= control target key end

     0   :  { %s1868_s0 = inlined_call_operand.vmem [shape: f32[16,64], index: 0, kind: input, shape index: {}]   ;;  %s1869_s1 = inlined_call_operand.vmem [shape: f32[64,192], index: 1, kind: input, shape index: {}]   ;;  %s1870_s2 = inlined_call_operand.vmem [shape: f32[64,192], index: 2, kind: input, shape index: {}]   ;;  %s1871_s3 = inlined_call_operand.vmem [shape: f32[1,192], index: 3, kind: input, shape index: {}]   ;;  %s1872_s4 = inlined_call_operand.vmem [shape: f32[1,64], index: 4, kind: input, shape index: {}]   ;;  %s1873_s5 = inlined_call_operand.vmem [shape: f32[64,32], index: 5, kind: input, shape index: {}]   ;;  %s1874_s6 = inlined_call_operand.vmem [shape: f32[1,32], index: 6, kind: input, shape index: {}]   ;;  %s1875_s7 = inlined_call_operand.vmem [shape: f32[16,2,32], index: 7, kind: output, shape index: {0}]   ;;  %s1876_s8 = inlined_call_operand.hbm [shape: f32[2,32], index: 8, kind: output, shape index: {1}]  }
   0x1   :  { %v46_v0 = vld [vmem:[%s1869_s1 + $0x78] sm:$0xff]  ;;  %v45_v2 = vld [vmem:[%s1869_s1 + $0x70] sm:$0xff]  ;;  %v44_v4 = vld [vmem:[%s1869_s1 + $0x68] sm:$0xff] }
   0x2   :  { %v1364_v1 = vld [vmem:[%s1870_s2 + $0x78] sm:$0xff]  ;;  %82 = vmatprep.subr.mxu0 %v46_v0  ;;  %v1373_v3 = vld [vmem:[%s1870_s2 + $0x70] sm:$0xff]  ;;  %v1381_v5 = vld [vmem:[%s1870_s2 + $0x68] sm:$0xff] }
   0x3   :  { %179 = vmatprep.subr.mxu1 %v1364_v1  ;;  %83 = vmatpush1.msra.mxu0 %v45_v2  ;;  %v43_v6 = vld [vmem:[%s1869_s1 + $0x60] sm:$0xff]  ;;  %v42_v8 = vld [vmem:[%s1869_s1 + $0x58] sm:$0xff]  ;;  %v41_v10 = vld [vmem:[%s1869_s1 + $0x50] sm:$0xff] }
   0x4   :  { %180 = vmatpush1.msra.mxu1 %v1373_v3  ;;  %v1390_v7 = vld [vmem:[%s1870_s2 + $0x60] sm:$0xff]  ;;  %84 = vmatprep.subr.mxu0 %v44_v4  ;;  %v1399_v9 = vld [vmem:[%s1870_s2 + $0x58] sm:$0xff]  ;;  %v1407_v11 = vld [vmem:[%s1870_s2 + $0x50] sm:$0xff] }
   0x5   :  { %181 = vmatprep.subr.mxu1 %v1381_v5  ;;  %85 = vmatpush1.msra.mxu0 %v43_v6  ;;  %v40_v12 = vld [vmem:[%s1869_s1 + $0x48] sm:$0xff]  ;;  %v39_v14 = vld [vmem:[%s1869_s1 + $0x40] sm:$0xff]  ;;  %v38_v16 = vld [vmem:[%s1869_s1 + $0x38] sm:$0xff] }
   0x6   :  { %182 = vmatpush1.msra.mxu1 %v1390_v7  ;;  %v1416_v13 = vld [vmem:[%s1870_s2 + $0x48] sm:$0xff]  ;;  %86 = vmatprep.subr.mxu0 %v42_v8  ;;  %v1425_v15 = vld [vmem:[%s1870_s2 + $0x40] sm:$0xff]  ;;  %v1434_v17 = vld [vmem:[%s1870_s2 + $0x38] sm:$0xff] }
   0x7   :  { %183 = vmatprep.subr.mxu1 %v1399_v9  ;;  %87 = vmatpush1.msra.mxu0 %v41_v10  ;;  %v37_v18 = vld [vmem:[%s1869_s1 + $0x30] sm:$0xff]  ;;  %v36_v20 = vld [vmem:[%s1869_s1 + $0x28] sm:$0xff]  ;;  %v35_v22 = vld [vmem:[%s1869_s1 + $0x20] sm:$0xff] }
   0x8   :  { %184 = vmatpush1.msra.mxu1 %v1407_v11  ;;  %88 = vmatprep.subr.mxu0 %v40_v12  ;;  %v1443_v19 = vld [vmem:[%s1870_s2 + $0x30] sm:$0xff]  ;;  %v1452_v21 = vld [vmem:[%s1870_s2 + $0x28] sm:$0xff]  ;;  %v1461_v23 = vld [vmem:[%s1870_s2 + $0x20] sm:$0xff] }
   0x9   :  { %185 = vmatprep.subr.mxu1 %v1416_v13  ;;  %89 = vmatpush1.msra.mxu0 %v39_v14  ;;  %v34_v24 = vld [vmem:[%s1869_s1 + $0x18] sm:$0xff]  ;;  %v33_v26 = vld [vmem:[%s1869_s1 + $0x10] sm:$0xff] }
   0xa   :  { %186 = vmatpush1.msra.mxu1 %v1425_v15  ;;  %90 = vmatprep.subr.mxu0 %v38_v16  ;;  %v1470_v25 = vld [vmem:[%s1870_s2 + $0x18] sm:$0xff]  ;;  %v1479_v27 = vld [vmem:[%s1870_s2 + $0x10] sm:$0xff] }
   0xb   :  { %187 = vmatprep.subr.mxu1 %v1434_v17  ;;  %91 = vmatpush1.msra.mxu0 %v37_v18 }
   0xc   :  { %188 = vmatpush1.msra.mxu1 %v1443_v19  ;;  %92 = vmatprep.subr.mxu0 %v36_v20 }
   0xd   :  { %189 = vmatprep.subr.mxu1 %v1452_v21 }
   0xe   :  { %14 = vsyncpa [#allocation3], 0  ;;  %93 = vmatpush1.msra.mxu0 %v35_v22  ;;  %190 = vmatpush1.msra.mxu1 %v1461_v23  ;;  %v32_v28 = vld [vmem:[%s1869_s1 + $0x8] sm:$0xff]  ;;  %v31_v30 = vld [vmem:[%s1869_s1] sm:$0xff]  ;;  %vm59_vm0 = vcmask 523264   ;;  %v1308_v33 = vmov 0.0   ;;  %v49_v34 = vlaneseq }
   0xf   :  { %v1488_v29 = vld [vmem:[%s1870_s2 + $0x8] sm:$0xff]  ;;  %94 = vmatprep.subr.mxu0 %v34_v24  ;;  %191 = vmatprep.subr.mxu1 %v1470_v25  ;;  %v1498_v31 = vld [vmem:[%s1870_s2] sm:$0xff]  ;;  %vm263_vm1 = vcmask 254976   ;;  %s1310_s11 = smov 32   ;;  %vm1311_vm2 = vmmov 0   ;;  %vm375_vm3 = vcmask 257026  }
  0x10   :  { %95 = vmatpush1.msra.mxu0 %v33_v26  ;;  %192 = vmatpush1.msra.mxu1 %v1479_v27  ;;  %v29_v32 = vld [vmem:[%s1868_s0] sm:$0xff]  ;;  %v50_v35 = vshrl.u32 %v49_v34, 7  ;;  %v30_v56 = vld [vmem:[%s1868_s0 + $0x8] sm:$0xff]  ;;  %vm490_vm4 = vcmask 259076   ;;  %vm605_vm5 = vcmask 261126  }
  0x11   :  { %96 = vmatprep.subr.mxu0 %v32_v28  ;;  %193 = vmatprep.subr.mxu1 %v1488_v29  ;;  %v47_v37 = vld [vmem:[%s1871_s3] sm:$0x3] }
  0x12   :  { %97 = vmatpush1.msra.mxu0 %v31_v30  ;;  %130 = vmatprep.mubr.f32.mxu0 %v1308_v33  ;;  %v51_v36 = vsub.s32 0, %v50_v35  ;;  %v55_v46 = vsub.s32 1, %v50_v35  ;;  %v1557_v47 = vld [vmem:[%s1872_s4] ss:$0 sm:$0xff]  ;;  %s1309_s4 = smov 64  }
  0x13   :  { %194 = vmatpush1.msra.mxu1 %v1498_v31  ;;  %227 = vmatprep.mubr.f32.mxu1 %v1308_v33 }
  0x14   :  { %1168 = vmatmul.mubr.msk.f32.vlgmr.msra.gmra.mxu0 %vm59_vm0, %v29_v32  ;;  %228 = vmatmul.mubr.f32.vlgmr.msra.gmra.mxu1 %v1308_v33  ;;  %v1548_v38 = vrot.slane %v47_v37, %v51_v36  ;;  %v1559_v49 = vrot.slane %v47_v37, %v55_v46 }
  0x15   :  { %288 = vmatprep.subr.mxu0 %v1364_v1  ;;  %136 = vmatprep.mubr.f32.mxu0 %v1308_v33 }
  0x16   :  { %289 = vmatpush1.msra.mxu0 %v1373_v3  ;;  %403 = vmatprep.subr.mxu1 %v1364_v1 }
  0x17   :  { %290 = vmatprep.subr.mxu0 %v1381_v5  ;;  %404 = vmatpush1.msra.mxu1 %v1373_v3 }
  0x18   :  { %291 = vmatpush1.msra.mxu0 %v1390_v7  ;;  %405 = vmatprep.subr.mxu1 %v1381_v5 }
  0x19   :  { %292 = vmatprep.subr.mxu0 %v1399_v9  ;;  %406 = vmatpush1.msra.mxu1 %v1390_v7 }
  0x1a   :  { %293 = vmatpush1.msra.mxu0 %v1407_v11  ;;  %407 = vmatprep.subr.mxu1 %v1399_v9 }
  0x1b   :  { %294 = vmatprep.subr.mxu0 %v1416_v13  ;;  %408 = vmatpush1.msra.mxu1 %v1407_v11 }
  0x1c   :  { %295 = vmatpush1.msra.mxu0 %v1425_v15  ;;  %409 = vmatprep.subr.mxu1 %v1416_v13 }
  0x1d   :  { %296 = vmatprep.subr.mxu0 %v1434_v17  ;;  %410 = vmatpush1.msra.mxu1 %v1425_v15 }
  0x1e   :  { %297 = vmatpush1.msra.mxu0 %v1443_v19  ;;  %411 = vmatprep.subr.mxu1 %v1434_v17 }
  0x1f   :  { %298 = vmatprep.subr.mxu0 %v1452_v21  ;;  %412 = vmatpush1.msra.mxu1 %v1443_v19 }
  0x20   :  { %299 = vmatpush1.msra.mxu0 %v1461_v23  ;;  %413 = vmatprep.subr.mxu1 %v1452_v21 }
  0x21   :  { %300 = vmatprep.subr.mxu0 %v1470_v25  ;;  %414 = vmatpush1.msra.mxu1 %v1461_v23 }
  0x22   :  { %301 = vmatpush1.msra.mxu0 %v1479_v27  ;;  %415 = vmatprep.subr.mxu1 %v1470_v25 }
  0x23   :  { %302 = vmatprep.subr.mxu0 %v1488_v29  ;;  %416 = vmatpush1.msra.mxu1 %v1479_v27 }
  0x24   :  { %303 = vmatpush1.msra.mxu0 %v1498_v31  ;;  %417 = vmatprep.subr.mxu1 %v1488_v29 }
  0x25   :  { %418 = vmatpush1.msra.mxu1 %v1498_v31  ;;  %451 = vmatprep.mubr.f32.mxu1 %v1308_v33 }
  0x26   :  { %518 = vmatprep.subr.mxu0 %v1364_v1  ;;  %633 = vmatprep.subr.mxu1 %v1364_v1 }
  0x27   :  { %1169 = vmatmul.mubr.msk.f32.gmra.mxu0 %vm59_vm0, %v30_v56 }
  0x28   :  { %336 = vmatprep.mubr.f32.mxu0 %v1308_v33 }
  0xd4   :  { %v132_v39 = vpop.f32.mrf.mxu0  ;;  %v229_v41 = vpop.f32.mrf.mxu1 }
  0xd5   :  { %v1551_v40 = vadd.f32 %v132_v39, %v1548_v38 }
  0xd6   :  { %v231_v48 = vpop.f32.mrf.mxu1  ;;  %v134_v50 = vpop.f32.mrf.mxu0 }
  0xd7   :  { %v234_v42 = vadd.f32 %v229_v41, %v1551_v40  ;;  %v247_v51 = vadd.f32 %v1557_v47, %v231_v48  ;;  %v1563_v53 = vadd.f32 %v134_v50, %v1559_v49 }
  0xd9   :  { %v1170_v43 = vmul.f32 -1.442695, %v234_v42 }
  0xdb   :  { %1236 = vpow2.f32 %v1170_v43 }
  0xe7   :  { %v1598_v0 = vpop.f32.mrf.mxu0 }
  0xe8   :  { %v1237_v44 = vpop.eup %1236 }
  0xe9   :  { %v238_v45 = vadd.f32 1.0, %v1237_v44  ;;  %v1600_v2 = vpop.f32.mrf.mxu0 }
  0xeb   :  { %1238 = vrcp.f32 %v238_v45 }
  0xf8   :  { %v1239_v52 = vpop.eup %1238 }
  0xf9   :  { %v248_v54 = vmul.f32 %v1239_v52, %v247_v51  ;;  %v251_v58 = vsub.f32 1.0, %v1239_v52  ;;  %v257_v60 = vmul.f32 0.0, %v1239_v52 }
  0xfb   :  { %v249_v55 = vadd.f32 %v248_v54, %v1563_v53 }
  0xfd   :  { %1240 = vtanh.f32 %v249_v55 }
 0x10a   :  { %v1241_v57 = vpop.eup %1240 }
 0x10b   :  { %253 = vrot.lane.b32.xlu0 %v1241_v57, %s1309_s4 }
 0x17d   :  { %v254_v59 = vpop.permute.xlu0 %253 }
 0x17e   :  { %v256_v61 = vmul.f32 %v254_v59, %v251_v58 }
 0x180   :  { %v1572_v62 = vadd.f32 %v257_v60, %v256_v61 }
 0x182   :  { %260 = vrot.lane.b32.xlu0 %v1572_v62, %s1309_s4  ;;  %v366_v32 = vrot.slane %v1572_v62, 6 }
 0x1f4   :  { %v261_v63 = vpop.permute.xlu0 %260 }
 0x1f5   :  { %264 = vst.msk [vmem:[%s1875_s7] sm:$0x3] %vm263_vm1, %v261_v63  ;;  %1173 = vmatmul.mubr.msk.f32.vlgmr.msra.gmra.mxu0 %vm59_vm0, %v261_v63 }
 0x1f6   :  { %519 = vmatpush1.msra.mxu0 %v1373_v3  ;;  %566 = vmatprep.mubr.f32.mxu0 %v1308_v33 }
 0x1f7   :  { %520 = vmatprep.subr.mxu0 %v1381_v5 }
 0x1f8   :  { %521 = vmatpush1.msra.mxu0 %v1390_v7 }
 0x1f9   :  { %522 = vmatprep.subr.mxu0 %v1399_v9 }
 0x1fa   :  { %523 = vmatpush1.msra.mxu0 %v1407_v11 }
 0x1fb   :  { %524 = vmatprep.subr.mxu0 %v1416_v13 }
 0x1fc   :  { %525 = vmatpush1.msra.mxu0 %v1425_v15 }
 0x1fd   :  { %526 = vmatprep.subr.mxu0 %v1434_v17 }
 0x1fe   :  { %527 = vmatpush1.msra.mxu0 %v1443_v19 }
 0x1ff   :  { %528 = vmatprep.subr.mxu0 %v1452_v21 }
 0x200   :  { %529 = vmatpush1.msra.mxu0 %v1461_v23 }
 0x201   :  { %530 = vmatprep.subr.mxu0 %v1470_v25 }
 0x202   :  { %531 = vmatpush1.msra.mxu0 %v1479_v27 }
 0x203   :  { %532 = vmatprep.subr.mxu0 %v1488_v29 }
 0x204   :  { %533 = vmatpush1.msra.mxu0 %v1498_v31 }
 0x205   :  { %737 = vmatprep.subr.mxu0 %v1364_v1 }
 0x2b5   :  { %v338_v4 = vpop.f32.mrf.mxu0 }
 0x2b6   :  { %v344_v6 = vrot.slane %v338_v4, 6 }
 0x2b7   :  { %v340_v16 = vpop.f32.mrf.mxu0 }
 0x2b8   :  { %v346_v8 = vadd.f32 %v344_v6, %v1551_v40  ;;  %v353_v18 = vadd.f32 %v1557_v47, %v340_v16 }
 0x2ba   :  { %v1174_v10 = vmul.f32 -1.442695, %v346_v8  ;;  %v355_v20 = vrot.slane %v353_v18, 6 }
 0x2bc   :  { %1242 = vpow2.f32 %v1174_v10 }
 0x2c9   :  { %v1243_v12 = vpop.eup %1242 }
 0x2ca   :  { %v350_v14 = vadd.f32 1.0, %v1243_v12 }
 0x2cc   :  { %1244 = vrcp.f32 %v350_v14 }
 0x2d9   :  { %v1245_v22 = vpop.eup %1244 }
 0x2da   :  { %v357_v24 = vmul.f32 %v1245_v22, %v355_v20  ;;  %v360_v30 = vsub.f32 1.0, %v1245_v22  ;;  %v368_v36 = vmul.f32 %v1245_v22, %v366_v32 }
 0x2dc   :  { %v358_v26 = vadd.f32 %v357_v24, %v1563_v53 }
 0x2de   :  { %1246 = vtanh.f32 %v358_v26 }
 0x2eb   :  { %v1247_v28 = vpop.eup %1246 }
 0x2ec   :  { %362 = vrot.lane.b32.xlu1 %v1247_v28, %s1309_s4 }
 0x35e   :  { %v363_v34 = vpop.permute.xlu1 %362 }
 0x35f   :  { %v365_v35 = vmul.f32 %v363_v34, %v360_v30 }
 0x361   :  { %v1607_v37 = vadd.f32 %v368_v36, %v365_v35 }
 0x363   :  { %v382_v39 = vrot.slane %v1607_v37, 2  ;;  %v481_v59 = vrot.slane %v1607_v37, 6 }
 0x365   :  { %383 = vrot.lane.b32.xlu1 %v382_v39, %s1309_s4 }
 0x3d7   :  { %v384_v41 = vpop.permute.xlu1 %383 }
 0x3d8   :  { %1177 = vmatmul.mubr.msk.f32.vlgmr.msra.gmra.mxu1 %vm59_vm0, %v384_v41 }
 0x3d9   :  { %634 = vmatpush1.msra.mxu1 %v1373_v3  ;;  %681 = vmatprep.mubr.f32.mxu1 %v1308_v33 }
 0x3da   :  { %635 = vmatprep.subr.mxu1 %v1381_v5 }
 0x3db   :  { %636 = vmatpush1.msra.mxu1 %v1390_v7 }
 0x3dc   :  { %637 = vmatprep.subr.mxu1 %v1399_v9 }
 0x3dd   :  { %638 = vmatpush1.msra.mxu1 %v1407_v11 }
 0x3de   :  { %639 = vmatprep.subr.mxu1 %v1416_v13 }
 0x3df   :  { %640 = vmatpush1.msra.mxu1 %v1425_v15 }
 0x3e0   :  { %641 = vmatprep.subr.mxu1 %v1434_v17 }
 0x3e1   :  { %642 = vmatpush1.msra.mxu1 %v1443_v19 }
 0x3e2   :  { %643 = vmatprep.subr.mxu1 %v1452_v21 }
 0x3e3   :  { %644 = vmatpush1.msra.mxu1 %v1461_v23 }
 0x3e4   :  { %645 = vmatprep.subr.mxu1 %v1470_v25 }
 0x3e5   :  { %646 = vmatpush1.msra.mxu1 %v1479_v27 }
 0x3e6   :  { %647 = vmatprep.subr.mxu1 %v1488_v29 }
 0x3e7   :  { %648 = vmatpush1.msra.mxu1 %v1498_v31 }
 0x3e8   :  { %851 = vmatprep.subr.mxu1 %v1364_v1 }
 0x498   :  { %v453_v42 = vpop.f32.mrf.mxu1 }
 0x499   :  { %v459_v43 = vrot.slane %v453_v42, 4 }
 0x49a   :  { %v455_v50 = vpop.f32.mrf.mxu1 }
 0x49b   :  { %v461_v44 = vadd.f32 %v459_v43, %v1551_v40  ;;  %v468_v51 = vadd.f32 %v1557_v47, %v455_v50 }
 0x49d   :  { %v1178_v45 = vmul.f32 -1.442695, %v461_v44  ;;  %v470_v52 = vrot.slane %v468_v51, 4 }
 0x49f   :  { %1248 = vpow2.f32 %v1178_v45 }
 0x4ac   :  { %v1249_v46 = vpop.eup %1248 }
 0x4ad   :  { %v465_v48 = vadd.f32 1.0, %v1249_v46 }
 0x4af   :  { %1250 = vrcp.f32 %v465_v48 }
 0x4bc   :  { %v1251_v54 = vpop.eup %1250 }
 0x4bd   :  { %v472_v55 = vmul.f32 %v1251_v54, %v470_v52  ;;  %v475_v58 = vsub.f32 1.0, %v1251_v54  ;;  %v483_v61 = vmul.f32 %v1251_v54, %v481_v59 }
 0x4bf   :  { %v473_v56 = vadd.f32 %v472_v55, %v1563_v53  ;;  %v1691_v55 = vadd.f32 %v1600_v2, %v1559_v49 }
 0x4c1   :  { %1252 = vtanh.f32 %v473_v56 }
 0x4ce   :  { %v1253_v57 = vpop.eup %1252 }
 0x4cf   :  { %477 = vrot.lane.b32.xlu0 %v1253_v57, %s1309_s4 }
 0x541   :  { %v478_v60 = vpop.permute.xlu0 %477 }
 0x542   :  { %v480_v63 = vmul.f32 %v478_v60, %v475_v58 }
 0x544   :  { %v1634_v4 = vadd.f32 %v483_v61, %v480_v63 }
 0x546   :  { %v497_v6 = vrot.slane %v1634_v4, 4 }
 0x548   :  { %498 = vrot.lane.b32.xlu1 %v497_v6, %s1309_s4 }
 0x5ba   :  { %v499_v8 = vpop.permute.xlu1 %498 }
 0x5bb   :  { %1181 = vmatmul.mubr.msk.f32.vlgmr.msra.gmra.mxu0 %vm59_vm0, %v499_v8 }
 0x5bc   :  { %738 = vmatpush1.msra.mxu0 %v1373_v3  ;;  %785 = vmatprep.mubr.f32.mxu0 %v1308_v33 }
 0x5bd   :  { %739 = vmatprep.subr.mxu0 %v1381_v5 }
 0x5be   :  { %740 = vmatpush1.msra.mxu0 %v1390_v7 }
 0x5bf   :  { %741 = vmatprep.subr.mxu0 %v1399_v9 }
 0x5c0   :  { %742 = vmatpush1.msra.mxu0 %v1407_v11 }
 0x5c1   :  { %743 = vmatprep.subr.mxu0 %v1416_v13 }
 0x5c2   :  { %744 = vmatpush1.msra.mxu0 %v1425_v15 }
 0x5c3   :  { %745 = vmatprep.subr.mxu0 %v1434_v17 }
 0x5c4   :  { %746 = vmatpush1.msra.mxu0 %v1443_v19 }
 0x5c5   :  { %747 = vmatprep.subr.mxu0 %v1452_v21 }
 0x5c6   :  { %748 = vmatpush1.msra.mxu0 %v1461_v23 }
 0x5c7   :  { %749 = vmatprep.subr.mxu0 %v1470_v25 }
 0x5c8   :  { %750 = vmatpush1.msra.mxu0 %v1479_v27 }
 0x5c9   :  { %751 = vmatprep.subr.mxu0 %v1488_v29 }
 0x5ca   :  { %752 = vmatpush1.msra.mxu0 %v1498_v31 }
 0x5cb   :  { %965 = vmatprep.subr.mxu0 %v1364_v1 }
 0x67b   :  { %v568_v10 = vpop.f32.mrf.mxu0 }
 0x67c   :  { %v574_v12 = vrot.slane %v568_v10, 2 }
 0x67d   :  { %v570_v22 = vpop.f32.mrf.mxu0 }
 0x67e   :  { %v576_v14 = vadd.f32 %v574_v12, %v1551_v40  ;;  %v583_v24 = vadd.f32 %v1557_v47, %v570_v22  ;;  %v596_v40 = vrot.slane %v1634_v4, 6 }
 0x680   :  { %v1182_v16 = vmul.f32 -1.442695, %v576_v14  ;;  %v585_v26 = vrot.slane %v583_v24, 2 }
 0x682   :  { %1254 = vpow2.f32 %v1182_v16 }
 0x68f   :  { %v1255_v18 = vpop.eup %1254 }
 0x690   :  { %v580_v20 = vadd.f32 1.0, %v1255_v18 }
 0x692   :  { %1256 = vrcp.f32 %v580_v20 }
 0x69f   :  { %v1257_v28 = vpop.eup %1256 }
 0x6a0   :  { %v587_v30 = vmul.f32 %v1257_v28, %v585_v26  ;;  %v590_v1 = vsub.f32 1.0, %v1257_v28  ;;  %v598_v36 = vmul.f32 %v1257_v28, %v596_v40 }
 0x6a2   :  { %v588_v32 = vadd.f32 %v587_v30, %v1563_v53  ;;  %v1685_v53 = vadd.f32 %v1598_v0, %v1548_v38 }
 0x6a4   :  { %1258 = vtanh.f32 %v588_v32 }
 0x6b1   :  { %v1259_v34 = vpop.eup %1258 }
 0x6b2   :  { %592 = vrot.lane.b32.xlu0 %v1259_v34, %s1309_s4 }
 0x724   :  { %v593_v35 = vpop.permute.xlu0 %592 }
 0x725   :  { %v595_v39 = vmul.f32 %v593_v35, %v590_v1 }
 0x727   :  { %v1661_v41 = vadd.f32 %v598_v36, %v595_v39 }
 0x729   :  { %v612_v42 = vrot.slane %v1661_v41, 6 }
 0x72b   :  { %613 = vrot.lane.b32.xlu1 %v612_v42, %s1309_s4 }
 0x79d   :  { %v614_v43 = vpop.permute.xlu1 %613 }
 0x79e   :  { %1185 = vmatmul.mubr.msk.f32.vlgmr.msra.gmra.mxu1 %vm59_vm0, %v614_v43 }
 0x79f   :  { %852 = vmatpush1.msra.mxu1 %v1373_v3  ;;  %899 = vmatprep.mubr.f32.mxu1 %v1308_v33 }
 0x7a0   :  { %853 = vmatprep.subr.mxu1 %v1381_v5 }
 0x7a1   :  { %854 = vmatpush1.msra.mxu1 %v1390_v7 }
 0x7a2   :  { %855 = vmatprep.subr.mxu1 %v1399_v9 }
 0x7a3   :  { %856 = vmatpush1.msra.mxu1 %v1407_v11 }
 0x7a4   :  { %857 = vmatprep.subr.mxu1 %v1416_v13 }
 0x7a5   :  { %858 = vmatpush1.msra.mxu1 %v1425_v15 }
 0x7a6   :  { %859 = vmatprep.subr.mxu1 %v1434_v17 }
 0x7a7   :  { %860 = vmatpush1.msra.mxu1 %v1443_v19 }
 0x7a8   :  { %861 = vmatprep.subr.mxu1 %v1452_v21 }
 0x7a9   :  { %862 = vmatpush1.msra.mxu1 %v1461_v23 }
 0x7aa   :  { %863 = vmatprep.subr.mxu1 %v1470_v25 }
 0x7ab   :  { %864 = vmatpush1.msra.mxu1 %v1479_v27 }
 0x7ac   :  { %865 = vmatprep.subr.mxu1 %v1488_v29 }
 0x7ad   :  { %866 = vmatpush1.msra.mxu1 %v1498_v31 }
 0x7ae   :  { %1212 = vmatprep.subr.mxu1 %v1308_v33 }
 0x85e   :  { %v683_v44 = vpop.f32.mrf.mxu1 }
 0x85f   :  { %v688_v45 = vadd.f32 %v683_v44, %v1685_v53 }
 0x860   :  { %v685_v51 = vpop.f32.mrf.mxu1 }
 0x861   :  { %v1186_v46 = vmul.f32 -1.442695, %v688_v45  ;;  %v695_v52 = vadd.f32 %v1557_v47, %v685_v51 }
 0x863   :  { %1260 = vpow2.f32 %v1186_v46 }
 0x870   :  { %v1261_v48 = vpop.eup %1260 }
 0x871   :  { %v692_v50 = vadd.f32 1.0, %v1261_v48 }
 0x873   :  { %1262 = vrcp.f32 %v692_v50 }
 0x880   :  { %v1263_v54 = vpop.eup %1262 }
 0x881   :  { %v696_v56 = vmul.f32 %v1263_v54, %v695_v52  ;;  %v699_v57 = vsub.f32 1.0, %v1263_v54  ;;  %v706_v59 = vmul.f32 %v1263_v54, %v612_v42 }
 0x883   :  { %v697_v38 = vadd.f32 %v696_v56, %v1691_v55 }
 0x885   :  { %1264 = vtanh.f32 %v697_v38 }
 0x892   :  { %v1265_v0 = vpop.eup %1264 }
 0x893   :  { %701 = vrot.lane.b32.xlu0 %v1265_v0, %s1309_s4 }
 0x905   :  { %v702_v58 = vpop.permute.xlu0 %701 }
 0x906   :  { %v704_v60 = vmul.f32 %v702_v58, %v699_v57 }
 0x908   :  { %v1695_v61 = vadd.f32 %v706_v59, %v704_v60 }
 0x90a   :  { %709 = vrot.lane.b32.xlu1 %v1695_v61, %s1309_s4 }
 0x97c   :  { %v710_v63 = vpop.permute.xlu1 %709 }
 0x97d   :  { %1187 = vst.msk [vmem:[%s1875_s7 + $0x8] sm:$0x3] %vm263_vm1, %v710_v63  ;;  %1189 = vmatmul.mubr.msk.f32.vlgmr.msra.gmra.mxu0 %vm59_vm0, %v710_v63 }
 0x97e   :  { %966 = vmatpush1.msra.mxu0 %v1373_v3  ;;  %1013 = vmatprep.mubr.f32.mxu0 %v1308_v33 }
 0x97f   :  { %967 = vmatprep.subr.mxu0 %v1381_v5 }
 0x980   :  { %968 = vmatpush1.msra.mxu0 %v1390_v7 }
 0x981   :  { %969 = vmatprep.subr.mxu0 %v1399_v9 }
 0x982   :  { %970 = vmatpush1.msra.mxu0 %v1407_v11 }
 0x983   :  { %971 = vmatprep.subr.mxu0 %v1416_v13 }
 0x984   :  { %972 = vmatpush1.msra.mxu0 %v1425_v15 }
 0x985   :  { %973 = vmatprep.subr.mxu0 %v1434_v17 }
 0x986   :  { %974 = vmatpush1.msra.mxu0 %v1443_v19 }
 0x987   :  { %975 = vmatprep.subr.mxu0 %v1452_v21 }
 0x988   :  { %976 = vmatpush1.msra.mxu0 %v1461_v23 }
 0x989   :  { %977 = vmatprep.subr.mxu0 %v1470_v25 }
 0x98a   :  { %978 = vmatpush1.msra.mxu0 %v1479_v27 }
 0x98b   :  { %979 = vmatprep.subr.mxu0 %v1488_v29 }
 0x98c   :  { %980 = vmatpush1.msra.mxu0 %v1498_v31  ;;  %v815_v31 = vrot.slane %v1695_v61, 6 }
 0xa3d   :  { %v787_v3 = vpop.f32.mrf.mxu0 }
 0xa3e   :  { %v793_v5 = vrot.slane %v787_v3, 6  ;;  %v1061_v3 = vld [vmem:[%s1873_s5 + $0x18] sm:$0xff] }
 0xa3f   :  { %v789_v15 = vpop.f32.mrf.mxu0 }
 0xa40   :  { %v795_v7 = vadd.f32 %v793_v5, %v1685_v53  ;;  %v802_v17 = vadd.f32 %v1557_v47, %v789_v15  ;;  %v1060_v5 = vld [vmem:[%s1873_s5 + $0x10] sm:$0xff] }
 0xa42   :  { %v1190_v9 = vmul.f32 -1.442695, %v795_v7  ;;  %v804_v19 = vrot.slane %v802_v17, 6  ;;  %v1059_v7 = vld [vmem:[%s1873_s5 + $0x8] sm:$0xff] }
 0xa44   :  { %1266 = vpow2.f32 %v1190_v9  ;;  %v1058_v9 = vld [vmem:[%s1873_s5] sm:$0xff] }
 0xa51   :  { %v1267_v11 = vpop.eup %1266 }
 0xa52   :  { %v799_v13 = vadd.f32 1.0, %v1267_v11 }
 0xa54   :  { %1268 = vrcp.f32 %v799_v13 }
 0xa61   :  { %v1269_v21 = vpop.eup %1268 }
 0xa62   :  { %v806_v23 = vmul.f32 %v1269_v21, %v804_v19  ;;  %v809_v29 = vsub.f32 1.0, %v1269_v21  ;;  %v817_v6 = vmul.f32 %v1269_v21, %v815_v31 }
 0xa64   :  { %v807_v25 = vadd.f32 %v806_v23, %v1691_v55 }
 0xa66   :  { %1270 = vtanh.f32 %v807_v25 }
 0xa73   :  { %v1271_v27 = vpop.eup %1270 }
 0xa74   :  { %811 = vrot.lane.b32.xlu0 %v1271_v27, %s1309_s4 }
 0xae6   :  { %v812_v49 = vpop.permute.xlu0 %811 }
 0xae7   :  { %v814_v2 = vmul.f32 %v812_v49, %v809_v29 }
 0xae9   :  { %v1725_v8 = vadd.f32 %v817_v6, %v814_v2 }
 0xaeb   :  { %v830_v10 = vrot.slane %v1725_v8, 2  ;;  %v929_v36 = vrot.slane %v1725_v8, 6 }
 0xaed   :  { %831 = vrot.lane.b32.xlu1 %v830_v10, %s1309_s4 }
 0xb5f   :  { %v832_v12 = vpop.permute.xlu1 %831 }
 0xb60   :  { %1193 = vmatmul.mubr.msk.f32.vlgmr.msra.gmra.mxu1 %vm59_vm0, %v832_v12 }
 0xb61   :  { %1228 = vmatprep.mubr.msk.f32.mxu1 %vm1311_vm2, %v1308_v33 }
 0xc20   :  { %v901_v14 = vpop.f32.mrf.mxu1 }
 0xc21   :  { %v907_v16 = vrot.slane %v901_v14, 4  ;;  %v1201_v14 = vld [vmem:[%s1874_s6] ss:$0 sm:$0xff] }
 0xc22   :  { %v903_v26 = vpop.f32.mrf.mxu1 }
 0xc23   :  { %v909_v18 = vadd.f32 %v907_v16, %v1685_v53  ;;  %v916_v28 = vadd.f32 %v1557_v47, %v903_v26 }
 0xc25   :  { %v1194_v20 = vmul.f32 -1.442695, %v909_v18  ;;  %v918_v30 = vrot.slane %v916_v28, 4 }
 0xc27   :  { %1272 = vpow2.f32 %v1194_v20 }
 0xc34   :  { %v1273_v22 = vpop.eup %1272 }
 0xc35   :  { %v913_v24 = vadd.f32 1.0, %v1273_v22 }
 0xc37   :  { %1274 = vrcp.f32 %v913_v24 }
 0xc44   :  { %v1275_v32 = vpop.eup %1274 }
 0xc45   :  { %v920_v34 = vmul.f32 %v1275_v32, %v918_v30  ;;  %v923_v35 = vsub.f32 1.0, %v1275_v32  ;;  %v931_v42 = vmul.f32 %v1275_v32, %v929_v36 }
 0xc47   :  { %v921_v1 = vadd.f32 %v920_v34, %v1691_v55 }
 0xc49   :  { %1276 = vtanh.f32 %v921_v1 }
 0xc56   :  { %v1277_v40 = vpop.eup %1276 }
 0xc57   :  { %925 = vrot.lane.b32.xlu0 %v1277_v40, %s1309_s4 }
 0xcc9   :  { %v926_v39 = vpop.permute.xlu0 %925 }
 0xcca   :  { %v928_v43 = vmul.f32 %v926_v39, %v923_v35 }
 0xccc   :  { %v1735_v44 = vadd.f32 %v931_v42, %v928_v43 }
 0xcce   :  { %v944_v45 = vrot.slane %v1735_v44, 4  ;;  %v1043_v13 = vrot.slane %v1735_v44, 6 }
 0xcd0   :  { %945 = vrot.lane.b32.xlu1 %v944_v45, %s1309_s4 }
 0xd42   :  { %v946_v46 = vpop.permute.xlu1 %945 }
 0xd43   :  { %1197 = vmatmul.mubr.msk.f32.vlgmr.msra.gmra.mxu0 %vm59_vm0, %v946_v46 }
 0xe03   :  { %v1015_v48 = vpop.f32.mrf.mxu0 }
 0xe04   :  { %v1021_v50 = vrot.slane %v1015_v48, 2 }
 0xe05   :  { %v1017_v38 = vpop.f32.mrf.mxu0 }
 0xe06   :  { %v1023_v51 = vadd.f32 %v1021_v50, %v1685_v53  ;;  %v1030_v0 = vadd.f32 %v1557_v47, %v1017_v38  ;;  %v1065_v47 = vld [vmem:[%s1873_s5 + $0x38] sm:$0xff]  ;;  %v1063_v53 = vld [vmem:[%s1873_s5 + $0x28] sm:$0xff] }
 0xe07   :  { %1213 = vmatpush3.msra.mxu1 %v1065_v47 }
 0xe08   :  { %v1198_v52 = vmul.f32 -1.442695, %v1023_v51  ;;  %v1032_v57 = vrot.slane %v1030_v0, 2  ;;  %1214 = vmatprep.subr.mxu1 %v1308_v33 }
 0xe0a   :  { %1278 = vpow2.f32 %v1198_v52 }
 0xe17   :  { %v1279_v54 = vpop.eup %1278 }
 0xe18   :  { %v1027_v56 = vadd.f32 1.0, %v1279_v54 }
 0xe1a   :  { %1280 = vrcp.f32 %v1027_v56 }
 0xe27   :  { %v1281_v58 = vpop.eup %1280 }
 0xe28   :  { %v1034_v59 = vmul.f32 %v1281_v58, %v1032_v57  ;;  %v1037_v11 = vsub.f32 1.0, %v1281_v58  ;;  %v1045_v17 = vmul.f32 %v1281_v58, %v1043_v13 }
 0xe2a   :  { %v1035_v60 = vadd.f32 %v1034_v59, %v1691_v55  ;;  %v1062_v55 = vld [vmem:[%s1873_s5 + $0x20] sm:$0xff] }
 0xe2c   :  { %1282 = vtanh.f32 %v1035_v60 }
 0xe39   :  { %v1283_v63 = vpop.eup %1282 }
 0xe3a   :  { %1039 = vrot.lane.b32.xlu0 %v1283_v63, %s1309_s4 }
 0xe3e   :  { %265 = vrot.lane.b32.xlu0 %v1572_v62, %s1310_s11  ;;  %v1064_v62 = vld [vmem:[%s1873_s5 + $0x30] sm:$0xff]  ;;  %s1312_s5 = smov [#allocation2]  }
 0xe3f   :  { %1215 = vmatpush3.msra.mxu1 %v1064_v62  ;;  %s1158_s28 = sshll.u32 %s1312_s5, 4  ;;  %s1159_s28 = int_to_ptr.vmem [resolvable:$true] %s1158_s28 }
 0xe40   :  { %1216 = vmatprep.subr.mxu1 %v1308_v33  ;;  %s1286_s3 = scalar_lea.vmem %s1159_s28, 32  ;;  %p1291_p1 = scmp.lt.s32.totalorder %s1159_s28, %s1159_s28 }
 0xe41   :  { %1217 = vmatpush3.msra.mxu1 %v1063_v53  ;;  %p1287_p0 = scmp.ne.s32.totalorder %s1159_s28, %s1286_s3  ;;  %p1292_p2 = scmp.lt.s32.totalorder %s1286_s3, %s1286_s3 }
 0xe42   :  { %377 = vrot.lane.b32.xlu0 %v1607_v37, %s1310_s11  ;;  %1218 = vmatprep.subr.mxu1 %v1308_v33 }
 0xe43   :  { %1219 = vmatpush3.msra.mxu1 %v1062_v55  ;;  %p1293_p3 = por %p1292_p2, %p1291_p1 }
 0xe44   :  { %1220 = vmatprep.subr.mxu1 %v1308_v33 }
 0xe45   :  { %1221 = vmatpush3.msra.mxu1 %v1061_v3  ;;  %p1294_p4 = pnand %p1293_p3, %p1287_p0 }
 0xe46   :  { %492 = vrot.lane.b32.xlu0 %v1634_v4, %s1310_s11  ;;  %1222 = vmatprep.subr.mxu1 %v1308_v33 }
 0xe47   :  { %1223 = vmatpush3.msra.mxu1 %v1060_v5 }
 0xe48   :  { %1224 = vmatprep.subr.mxu1 %v1308_v33 }
 0xe49   :  { %1225 = vmatpush3.msra.mxu1 %v1059_v7 }
 0xe4a   :  { %607 = vrot.lane.b32.xlu0 %v1661_v41, %s1310_s11  ;;  %1226 = vmatprep.subr.mxu1 %v1308_v33 }
 0xe4b   :  { %1227 = vmatpush3.msra.mxu1 %v1058_v9 }
 0xe4e   :  { %820 = vrot.lane.b32.xlu0 %v1725_v8, %s1309_s4 }
 0xe52   :  { %934 = vrot.lane.b32.xlu0 %v1735_v44, %s1309_s4 }
 0xeac   :  { %v1040_v15 = vpop.permute.xlu0 %1039 }
 0xead   :  { %v1042_v19 = vmul.f32 %v1040_v15, %v1037_v11 }
 0xeaf   :  { %v1046_v21 = vadd.f32 %v1045_v17, %v1042_v19 }
 0xeb0   :  { %v266_v23 = vpop.permute.xlu0 %265 }
 0xeb1   :  { %1172 = vst.msk [vmem:[%s1875_s7 + $0x1e] sm:$0x3] %vm263_vm1, %v266_v23  ;;  %1048 = vrot.lane.b32.xlu0 %v1046_v21, %s1309_s4  ;;  %v1073_v25 = vrot.slane %v1046_v21, 6 }
 0xeb3   :  { %1074 = vrot.lane.b32.xlu1 %v1073_v25, %s1309_s4 }
 0xeb4   :  { %v378_v33 = vpop.permute.xlu0 %377 }
 0xeb5   :  { %1176 = vst.msk [vmem:[%s1875_s7 + $0x1a] sm:$0xc] %vm375_vm3, %v378_v33 }
 0xeb7   :  { %371 = vrot.lane.b32.xlu1 %v1607_v37, %s1309_s4 }
 0xeb8   :  { %v493_v27 = vpop.permute.xlu0 %492 }
 0xeb9   :  { %1180 = vst.msk [vmem:[%s1875_s7 + $0x16] sm:$0x30] %vm490_vm4, %v493_v27 }
 0xebb   :  { %486 = vrot.lane.b32.xlu1 %v1634_v4, %s1309_s4 }
 0xebc   :  { %v608_v29 = vpop.permute.xlu0 %607 }
 0xebd   :  { %1184 = vst.msk [vmem:[%s1875_s7 + $0x12] sm:$0xc0] %vm605_vm5, %v608_v29 }
 0xebf   :  { %601 = vrot.lane.b32.xlu1 %v1661_v41, %s1309_s4 }
 0xec0   :  { %v821_v37 = vpop.permute.xlu0 %820 }
 0xec1   :  { %1191 = vst.msk [vmem:[%s1875_s7 + $0x8] sm:$0xc] %vm375_vm3, %v821_v37 }
 0xec3   :  { %714 = vrot.lane.b32.xlu1 %v1695_v61, %s1310_s11 }
 0xec4   :  { %v935_v31 = vpop.permute.xlu0 %934 }
 0xec5   :  { %1195 = vst.msk [vmem:[%s1875_s7 + $0x8] sm:$0x30] %vm490_vm4, %v935_v31 }
 0xec7   :  { %825 = vrot.lane.b32.xlu1 %v1725_v8, %s1310_s11 }
 0xecb   :  { %939 = vrot.lane.b32.xlu1 %v1735_v44, %s1310_s11 }
 0xecf   :  { %1053 = vrot.lane.b32.xlu1 %v1046_v21, %s1310_s11 }
 0xf23   :  { %v1049_v4 = vpop.permute.xlu0 %1048 }
 0xf24   :  { %1199 = vst.msk [vmem:[%s1875_s7 + $0x8] sm:$0xc0] %vm605_vm5, %v1049_v4 }
 0xf25   :  { %v1075_v41 = vpop.permute.xlu1 %1074 }
 0xf26   :  { %1229 = vmatmul.mubr.msk.f32.vlgmr.msra.gmra.mxu1 %vm59_vm0, %v1075_v41 }
 0xf29   :  { %v372_v61 = vpop.permute.xlu1 %371 }
 0xf2a   :  { %1175 = vst.msk [vmem:[%s1875_s7] sm:$0xc] %vm375_vm3, %v372_v61 }
 0xf2d   :  { %v487_v49 = vpop.permute.xlu1 %486 }
 0xf2e   :  { %1179 = vst.msk [vmem:[%s1875_s7] sm:$0x30] %vm490_vm4, %v487_v49 }
 0xf31   :  { %v602_v2 = vpop.permute.xlu1 %601 }
 0xf32   :  { %1183 = vst.msk [vmem:[%s1875_s7] sm:$0xc0] %vm605_vm5, %v602_v2 }
 0xf35   :  { %v715_v6 = vpop.permute.xlu1 %714 }
 0xf36   :  { %1188 = vst.msk [vmem:[%s1875_s7 + $0x16] sm:$0x3] %vm263_vm1, %v715_v6 }
 0xf39   :  { %v826_v8 = vpop.permute.xlu1 %825 }
 0xf3a   :  { %1192 = vst.msk [vmem:[%s1875_s7 + $0x12] sm:$0xc] %vm375_vm3, %v826_v8 }
 0xf3d   :  { %v940_v10 = vpop.permute.xlu1 %939 }
 0xf3e   :  { %1196 = vst.msk [vmem:[%s1875_s7 + $0xe] sm:$0x30] %vm490_vm4, %v940_v10 }
 0xf41   :  { %v1054_v12 = vpop.permute.xlu1 %1053 }
 0xf42   :  { %1200 = vst.msk [vmem:[%s1875_s7 + $0xa] sm:$0xc0] %vm605_vm5, %v1054_v12 }
 0xfe6   :  { %v1144_v16 = vpop.f32.mrf.mxu1 }
 0xfe7   :  { %v1145_v18 = vadd.f32 %v1201_v14, %v1144_v16 }
 0xfe8   :  { %v1230_v20 = vpop.f32.mrf.mxu1 }
 0xfe9   :  { %1284 = vtanh.f32 %v1145_v18 }
 0xff6   :  { %v1285_v22 = vpop.eup %1284 }
 0xff7   :  { %1149 = vst.msk [vmem:[#allocation2] sm:$0x3] %vm263_vm1, %v1285_v22 }
 0xff8   :  { %1297 = shalt.err (!%p1294_p4)
}
 0xff9   :  { %1161 = dma.vmem_to_hbm [thread:$0]  %s1159_s28, 32, %s1876_s8, [#allocation3]  }
 0xffa   :  { %1306 = dma.done.wait [#allocation3], 32  }
 0xffb   :  { %1307 = vsyncadd [#allocation3], 4294967264 }
 0xffc   :  { %1167 = vsyncpa [#allocation3], 1 }

</bundles_post_ra>
